<compile_context>
chip_gen: v7x
topology: tpu7x:2x2x1
jax: 0.10.0
libtpu: 0.0.40
codegen_flags: <defaults>
</compile_context>

<pallas_src>
import jax
import jax.numpy as jnp
from jax import lax
from jax.experimental import pallas as pl
from jax.experimental.pallas import tpu as pltpu

IN_DIM, HIDDEN, OUT_DIM = 4, 20, 2
BN_EPS = 1e-5

# Batch size above which the unrolled VPU-FMA matmuls would start saturating VALU slots and
# the MXU becomes worthwhile again (trace-time Python switch, no runtime cost).
MXU_MIN_BATCH = 512

# ------------------------- parameter-slab layout (80 x 128 f32) -------------------------
# Weights are stored (in_features, out_features) so row k of a weight block is exactly the
# (1, n_out) vector needed by the k-th broadcast-FMA.  Per-feature vectors are single rows
# (they broadcast over the batch/sublane axis for free).  b1/b2 are intentionally absent.
ROW_W0 = 0            # (4, 20)  in_layer weight
ROW_B0 = 4            # (1, 20)  in_layer bias
ROW_W1 = 8            # (20, 20) h1 weight        (b1 omitted: cancels in training-mode BN)
ROW_G1 = 28           # (1, 20)  bn1 gamma
ROW_BE1 = 29          # (1, 20)  bn1 beta
ROW_W2 = 32           # (20, 20) h2 weight        (b2 omitted: cancels in training-mode BN)
ROW_G2 = 52           # (1, 20)  bn2 gamma
ROW_BE2 = 53          # (1, 20)  bn2 beta
ROW_W3 = 56           # (20, 2)  out_layer weight
ROW_B3 = 76           # (1, 2)   out_layer bias
SLAB_ROWS, SLAB_LANES = 80, 128


def net_kernel(x_ref, p_ref, o_ref):
    """x_ref: (B, 4) batch-major input.  p_ref: (80, 128) parameter slab.
    o_ref: (B, 2) batch-major output.  Whole module runs in this single program."""
    B = x_ref.shape[0]
    inv_b = 1.0 / B
    use_mxu = B >= MXU_MIN_BATCH     # trace-time decision; only one path is ever traced

    def row(r, width):
        # (1, width) parameter row; broadcasts over the batch (sublane) axis for free.
        return p_ref[r:r + 1, 0:width]

    def fma_matmul(h, row_w, n_in, n_out):
        # h(B, n_in) @ W(n_in, n_out) as n_in unrolled VPU broadcast-FMAs:
        # (h[:, k] lane-broadcast) * (W[k, :] sublane-broadcast).  Skips the MXU round-trip,
        # which is >90% padding at these contraction widths.
        acc = h[:, 0:1] * row(row_w, n_out)
        for k in range(1, n_in):
            acc = acc + h[:, k:k + 1] * row(row_w + k, n_out)
        return acc

    def matmul(h, row_w, n_in, n_out):
        if use_mxu:      # large batches only: VALU slots saturate, hand it to the MXU
            w = p_ref[row_w:row_w + n_in, 0:n_out]
            return jnp.dot(h, w, preferred_element_type=jnp.float32)
        return fma_matmul(h, row_w, n_in, n_out)

    x = x_ref[...]                                              # (B, 4) f32

    # ----- in_layer: Linear(4, 20) + ReLU (K=4 -> always VPU FMAs) -----
    h = jnp.maximum(fma_matmul(x, ROW_W0, IN_DIM, HIDDEN) + row(ROW_B0, HIDDEN), 0.0)

    # ----- hidden layers: Linear(20,20, bias dropped) + BN1d(training batch stats) + ReLU -----
    def bn_relu_layer(h, row_w, row_g, row_be):
        z = matmul(h, row_w, HIDDEN, HIDDEN)                    # (B, 20); bias cancels in BN
        # Single-pass batch statistics: the two reductions issue back to back.
        s1 = jnp.sum(z, axis=0, keepdims=True)                  # (1, 20)
        s2 = jnp.sum(z * z, axis=0, keepdims=True)              # (1, 20)
        mean = s1 * inv_b
        var = jnp.maximum(s2 * inv_b - mean * mean, 0.0)        # biased var; clamp cancellation
        scale = row(row_g, HIDDEN) * lax.rsqrt(var + BN_EPS)    # fused BN affine
        shift = row(row_be, HIDDEN) - mean * scale
        return jnp.maximum(z * scale + shift, 0.0)

    h = bn_relu_layer(h, ROW_W1, ROW_G1, ROW_BE1)
    h = bn_relu_layer(h, ROW_W2, ROW_G2, ROW_BE2)

    # ----- out_layer: Linear(20, 2), written directly as (B, 2) -----
    o = matmul(h, ROW_W3, HIDDEN, OUT_DIM) + row(ROW_B3, OUT_DIM)
    o_ref[...] = o.astype(o_ref.dtype)


def pack_params(p):
    """Pack all parameters the forward needs into one (80, 128) f32 slab (one DMA).

    Call ONCE per parameter update (e.g. right after the optimizer step), NOT per forward:
    re-packing inside the jitted forward costs as much as the kernel itself.
    b1/b2 are intentionally NOT packed — a per-feature constant added immediately before a
    training-mode BatchNorm cancels exactly in (z - batch_mean)."""
    slab = jnp.zeros((SLAB_ROWS, SLAB_LANES), jnp.float32)
    slab = slab.at[ROW_W0:ROW_W0 + IN_DIM, 0:HIDDEN].set(p["w0"])
    slab = slab.at[ROW_B0, 0:HIDDEN].set(p["b0"].reshape(-1))
    slab = slab.at[ROW_W1:ROW_W1 + HIDDEN, 0:HIDDEN].set(p["w1"])
    slab = slab.at[ROW_G1, 0:HIDDEN].set(p["g1"].reshape(-1))
    slab = slab.at[ROW_BE1, 0:HIDDEN].set(p["be1"].reshape(-1))
    slab = slab.at[ROW_W2:ROW_W2 + HIDDEN, 0:HIDDEN].set(p["w2"])
    slab = slab.at[ROW_G2, 0:HIDDEN].set(p["g2"].reshape(-1))
    slab = slab.at[ROW_BE2, 0:HIDDEN].set(p["be2"].reshape(-1))
    slab = slab.at[ROW_W3:ROW_W3 + HIDDEN, 0:OUT_DIM].set(p["w3"])
    slab = slab.at[ROW_B3, 0:OUT_DIM].set(p["b3"].reshape(-1))
    return slab


@jax.jit
def net_forward(x, slab):
    """x: (B, 4) f32, slab: pre-packed (80, 128) parameter slab -> (B, 2) f32.
    The whole forward is ONE device launch: no wrapper-side packing, no transposes."""
    B = x.shape[0]
    # No grid: single invocation, whole arrays resident in VMEM, nothing to pipeline.
    return pl.pallas_call(
        net_kernel,
        out_shape=jax.ShapeDtypeStruct((B, OUT_DIM), jnp.float32),
        in_specs=[pl.BlockSpec(memory_space=pltpu.MemorySpace.VMEM),
                  pl.BlockSpec(memory_space=pltpu.MemorySpace.VMEM)],
        out_specs=pl.BlockSpec(memory_space=pltpu.MemorySpace.VMEM),
    )(x, slab)


def init_params(key):
    """Deterministic synthetic parameters matching the PyTorch module's shapes.
    Linear weights stored as (in, out); biases / BN params stored as (1, dim)."""
    ks = jax.random.split(key, 8)

    def lin(kw, kb, din, dout):
        w = jax.random.normal(kw, (din, dout), jnp.float32) * (1.0 / jnp.sqrt(din))
        b = jax.random.normal(kb, (1, dout), jnp.float32) * 0.01
        return w, b

    w0, b0 = lin(ks[0], ks[1], IN_DIM, HIDDEN)    # in_layer:  Linear(4, 20)
    w1, b1 = lin(ks[2], ks[3], HIDDEN, HIDDEN)    # h1:        Linear(20, 20)
    w2, b2 = lin(ks[4], ks[5], HIDDEN, HIDDEN)    # h2:        Linear(20, 20)
    w3, b3 = lin(ks[6], ks[7], HIDDEN, OUT_DIM)   # out_layer: Linear(20, 2)

    # BatchNorm1d affine params, PyTorch default init: gamma=1, beta=0.
    g1 = jnp.ones((1, HIDDEN), jnp.float32)
    be1 = jnp.zeros((1, HIDDEN), jnp.float32)
    g2 = jnp.ones((1, HIDDEN), jnp.float32)
    be2 = jnp.zeros((1, HIDDEN), jnp.float32)

    return dict(w0=w0, b0=b0, w1=w1, b1=b1, g1=g1, be1=be1,
                w2=w2, b2=b2, g2=g2, be2=be2, w3=w3, b3=b3)


def net_reference(x, p):
    """Pure-JAX reference (full module math, including b1/b2) for correctness checking."""
    h = jnp.maximum(x @ p["w0"] + p["b0"], 0.0)
    z = h @ p["w1"] + p["b1"]
    m = z.mean(0, keepdims=True)
    v = ((z - m) ** 2).mean(0, keepdims=True)
    h = jnp.maximum((z - m) / jnp.sqrt(v + BN_EPS) * p["g1"] + p["be1"], 0.0)
    z = h @ p["w2"] + p["b2"]
    m = z.mean(0, keepdims=True)
    v = ((z - m) ** 2).mean(0, keepdims=True)
    h = jnp.maximum((z - m) / jnp.sqrt(v + BN_EPS) * p["g2"] + p["be2"], 0.0)
    return h @ p["w3"] + p["b3"]


if __name__ == "__main__":
    key = jax.random.PRNGKey(0)
    k_x, k_p = jax.random.split(key)

    B = 8  # small batch (BatchNorm1d training semantics needs batch > 1)
    x = jax.random.normal(k_x, (B, IN_DIM), jnp.float32)
    params = init_params(k_p)

    # Pack once per parameter update — NOT inside the per-step forward.
    slab = pack_params(params)

    out = net_forward(x, slab)
    out = jax.block_until_ready(out)

    ref = net_reference(x, params)
    assert out.shape == (B, OUT_DIM), out.shape
    assert jnp.allclose(out, ref, atol=2e-4, rtol=2e-4), (out, ref)

    print("KERNEL_OK")
</pallas_src>

<mosaic_0001>
module attributes {stable_mosaic.version = 11 : i64} {
  func.func @net_kernel(%arg0: memref<8x4xf32, #tpu.memory_space<vmem>>, %arg1: memref<80x128xf32, #tpu.memory_space<vmem>>, %arg2: memref<8x2xf32, #tpu.memory_space<vmem>>) attributes {dimension_semantics = [], scalar_prefetch = 0 : i64, scratch_operands = 0 : i64, tpu.core_type = #tpu.core_type<tc>} {
    %c0 = arith.constant 0 : index
    %c0_0 = arith.constant 0 : index
    %0 = vector.load %arg0[%c0, %c0_0] : memref<8x4xf32, #tpu.memory_space<vmem>>, vector<8x4xf32>
    %1 = vector.extract_strided_slice %0 {offsets = [0, 0], sizes = [8, 1], strides = [1, 1]} : vector<8x4xf32> to vector<8x1xf32>
    %c0_1 = arith.constant 0 : index
    %c0_2 = arith.constant 0 : index
    %2 = vector.load %arg1[%c0_1, %c0_2] : memref<80x128xf32, #tpu.memory_space<vmem>>, vector<1x20xf32>
    %3 = vector.broadcast %1 : vector<8x1xf32> to vector<8x20xf32>
    %4 = vector.broadcast %2 : vector<1x20xf32> to vector<8x20xf32>
    %5 = arith.mulf %3, %4 : vector<8x20xf32>
    %6 = vector.extract_strided_slice %0 {offsets = [0, 1], sizes = [8, 1], strides = [1, 1]} : vector<8x4xf32> to vector<8x1xf32>
    %c1 = arith.constant 1 : index
    %c0_3 = arith.constant 0 : index
    %7 = vector.load %arg1[%c1, %c0_3] : memref<80x128xf32, #tpu.memory_space<vmem>>, vector<1x20xf32>
    %8 = vector.broadcast %6 : vector<8x1xf32> to vector<8x20xf32>
    %9 = vector.broadcast %7 : vector<1x20xf32> to vector<8x20xf32>
    %10 = arith.mulf %8, %9 : vector<8x20xf32>
    %11 = arith.addf %5, %10 : vector<8x20xf32>
    %12 = vector.extract_strided_slice %0 {offsets = [0, 2], sizes = [8, 1], strides = [1, 1]} : vector<8x4xf32> to vector<8x1xf32>
    %c2 = arith.constant 2 : index
    %c0_4 = arith.constant 0 : index
    %13 = vector.load %arg1[%c2, %c0_4] : memref<80x128xf32, #tpu.memory_space<vmem>>, vector<1x20xf32>
    %14 = vector.broadcast %12 : vector<8x1xf32> to vector<8x20xf32>
    %15 = vector.broadcast %13 : vector<1x20xf32> to vector<8x20xf32>
    %16 = arith.mulf %14, %15 : vector<8x20xf32>
    %17 = arith.addf %11, %16 : vector<8x20xf32>
    %18 = vector.extract_strided_slice %0 {offsets = [0, 3], sizes = [8, 1], strides = [1, 1]} : vector<8x4xf32> to vector<8x1xf32>
    %c3 = arith.constant 3 : index
    %c0_5 = arith.constant 0 : index
    %19 = vector.load %arg1[%c3, %c0_5] : memref<80x128xf32, #tpu.memory_space<vmem>>, vector<1x20xf32>
    %20 = vector.broadcast %18 : vector<8x1xf32> to vector<8x20xf32>
    %21 = vector.broadcast %19 : vector<1x20xf32> to vector<8x20xf32>
    %22 = arith.mulf %20, %21 : vector<8x20xf32>
    %23 = arith.addf %17, %22 : vector<8x20xf32>
    %c4 = arith.constant 4 : index
    %c0_6 = arith.constant 0 : index
    %24 = vector.load %arg1[%c4, %c0_6] : memref<80x128xf32, #tpu.memory_space<vmem>>, vector<1x20xf32>
    %25 = vector.broadcast %24 : vector<1x20xf32> to vector<8x20xf32>
    %26 = arith.addf %23, %25 : vector<8x20xf32>
    %cst = arith.constant 0.000000e+00 : f32
    %27 = vector.broadcast %cst : f32 to vector<8x20xf32>
    %28 = arith.maximumf %26, %27 : vector<8x20xf32>
    %29 = vector.extract_strided_slice %28 {offsets = [0, 0], sizes = [8, 1], strides = [1, 1]} : vector<8x20xf32> to vector<8x1xf32>
    %c8 = arith.constant 8 : index
    %c0_7 = arith.constant 0 : index
    %30 = vector.load %arg1[%c8, %c0_7] : memref<80x128xf32, #tpu.memory_space<vmem>>, vector<1x20xf32>
    %31 = vector.broadcast %29 : vector<8x1xf32> to vector<8x20xf32>
    %32 = vector.broadcast %30 : vector<1x20xf32> to vector<8x20xf32>
    %33 = arith.mulf %31, %32 : vector<8x20xf32>
    %34 = vector.extract_strided_slice %28 {offsets = [0, 1], sizes = [8, 1], strides = [1, 1]} : vector<8x20xf32> to vector<8x1xf32>
    %c9 = arith.constant 9 : index
    %c0_8 = arith.constant 0 : index
    %35 = vector.load %arg1[%c9, %c0_8] : memref<80x128xf32, #tpu.memory_space<vmem>>, vector<1x20xf32>
    %36 = vector.broadcast %34 : vector<8x1xf32> to vector<8x20xf32>
    %37 = vector.broadcast %35 : vector<1x20xf32> to vector<8x20xf32>
    %38 = arith.mulf %36, %37 : vector<8x20xf32>
    %39 = arith.addf %33, %38 : vector<8x20xf32>
    %40 = vector.extract_strided_slice %28 {offsets = [0, 2], sizes = [8, 1], strides = [1, 1]} : vector<8x20xf32> to vector<8x1xf32>
    %c10 = arith.constant 10 : index
    %c0_9 = arith.constant 0 : index
    %41 = vector.load %arg1[%c10, %c0_9] : memref<80x128xf32, #tpu.memory_space<vmem>>, vector<1x20xf32>
    %42 = vector.broadcast %40 : vector<8x1xf32> to vector<8x20xf32>
    %43 = vector.broadcast %41 : vector<1x20xf32> to vector<8x20xf32>
    %44 = arith.mulf %42, %43 : vector<8x20xf32>
    %45 = arith.addf %39, %44 : vector<8x20xf32>
    %46 = vector.extract_strided_slice %28 {offsets = [0, 3], sizes = [8, 1], strides = [1, 1]} : vector<8x20xf32> to vector<8x1xf32>
    %c11 = arith.constant 11 : index
    %c0_10 = arith.constant 0 : index
    %47 = vector.load %arg1[%c11, %c0_10] : memref<80x128xf32, #tpu.memory_space<vmem>>, vector<1x20xf32>
    %48 = vector.broadcast %46 : vector<8x1xf32> to vector<8x20xf32>
    %49 = vector.broadcast %47 : vector<1x20xf32> to vector<8x20xf32>
    %50 = arith.mulf %48, %49 : vector<8x20xf32>
    %51 = arith.addf %45, %50 : vector<8x20xf32>
    %52 = vector.extract_strided_slice %28 {offsets = [0, 4], sizes = [8, 1], strides = [1, 1]} : vector<8x20xf32> to vector<8x1xf32>
    %c12 = arith.constant 12 : index
    %c0_11 = arith.constant 0 : index
    %53 = vector.load %arg1[%c12, %c0_11] : memref<80x128xf32, #tpu.memory_space<vmem>>, vector<1x20xf32>
    %54 = vector.broadcast %52 : vector<8x1xf32> to vector<8x20xf32>
    %55 = vector.broadcast %53 : vector<1x20xf32> to vector<8x20xf32>
    %56 = arith.mulf %54, %55 : vector<8x20xf32>
    %57 = arith.addf %51, %56 : vector<8x20xf32>
    %58 = vector.extract_strided_slice %28 {offsets = [0, 5], sizes = [8, 1], strides = [1, 1]} : vector<8x20xf32> to vector<8x1xf32>
    %c13 = arith.constant 13 : index
    %c0_12 = arith.constant 0 : index
    %59 = vector.load %arg1[%c13, %c0_12] : memref<80x128xf32, #tpu.memory_space<vmem>>, vector<1x20xf32>
    %60 = vector.broadcast %58 : vector<8x1xf32> to vector<8x20xf32>
    %61 = vector.broadcast %59 : vector<1x20xf32> to vector<8x20xf32>
    %62 = arith.mulf %60, %61 : vector<8x20xf32>
    %63 = arith.addf %57, %62 : vector<8x20xf32>
    %64 = vector.extract_strided_slice %28 {offsets = [0, 6], sizes = [8, 1], strides = [1, 1]} : vector<8x20xf32> to vector<8x1xf32>
    %c14 = arith.constant 14 : index
    %c0_13 = arith.constant 0 : index
    %65 = vector.load %arg1[%c14, %c0_13] : memref<80x128xf32, #tpu.memory_space<vmem>>, vector<1x20xf32>
    %66 = vector.broadcast %64 : vector<8x1xf32> to vector<8x20xf32>
    %67 = vector.broadcast %65 : vector<1x20xf32> to vector<8x20xf32>
    %68 = arith.mulf %66, %67 : vector<8x20xf32>
    %69 = arith.addf %63, %68 : vector<8x20xf32>
    %70 = vector.extract_strided_slice %28 {offsets = [0, 7], sizes = [8, 1], strides = [1, 1]} : vector<8x20xf32> to vector<8x1xf32>
    %c15 = arith.constant 15 : index
    %c0_14 = arith.constant 0 : index
    %71 = vector.load %arg1[%c15, %c0_14] : memref<80x128xf32, #tpu.memory_space<vmem>>, vector<1x20xf32>
    %72 = vector.broadcast %70 : vector<8x1xf32> to vector<8x20xf32>
    %73 = vector.broadcast %71 : vector<1x20xf32> to vector<8x20xf32>
    %74 = arith.mulf %72, %73 : vector<8x20xf32>
    %75 = arith.addf %69, %74 : vector<8x20xf32>
    %76 = vector.extract_strided_slice %28 {offsets = [0, 8], sizes = [8, 1], strides = [1, 1]} : vector<8x20xf32> to vector<8x1xf32>
    %c16 = arith.constant 16 : index
    %c0_15 = arith.constant 0 : index
    %77 = vector.load %arg1[%c16, %c0_15] : memref<80x128xf32, #tpu.memory_space<vmem>>, vector<1x20xf32>
    %78 = vector.broadcast %76 : vector<8x1xf32> to vector<8x20xf32>
    %79 = vector.broadcast %77 : vector<1x20xf32> to vector<8x20xf32>
    %80 = arith.mulf %78, %79 : vector<8x20xf32>
    %81 = arith.addf %75, %80 : vector<8x20xf32>
    %82 = vector.extract_strided_slice %28 {offsets = [0, 9], sizes = [8, 1], strides = [1, 1]} : vector<8x20xf32> to vector<8x1xf32>
    %c17 = arith.constant 17 : index
    %c0_16 = arith.constant 0 : index
    %83 = vector.load %arg1[%c17, %c0_16] : memref<80x128xf32, #tpu.memory_space<vmem>>, vector<1x20xf32>
    %84 = vector.broadcast %82 : vector<8x1xf32> to vector<8x20xf32>
    %85 = vector.broadcast %83 : vector<1x20xf32> to vector<8x20xf32>
    %86 = arith.mulf %84, %85 : vector<8x20xf32>
    %87 = arith.addf %81, %86 : vector<8x20xf32>
    %88 = vector.extract_strided_slice %28 {offsets = [0, 10], sizes = [8, 1], strides = [1, 1]} : vector<8x20xf32> to vector<8x1xf32>
    %c18 = arith.constant 18 : index
    %c0_17 = arith.constant 0 : index
    %89 = vector.load %arg1[%c18, %c0_17] : memref<80x128xf32, #tpu.memory_space<vmem>>, vector<1x20xf32>
    %90 = vector.broadcast %88 : vector<8x1xf32> to vector<8x20xf32>
    %91 = vector.broadcast %89 : vector<1x20xf32> to vector<8x20xf32>
    %92 = arith.mulf %90, %91 : vector<8x20xf32>
    %93 = arith.addf %87, %92 : vector<8x20xf32>
    %94 = vector.extract_strided_slice %28 {offsets = [0, 11], sizes = [8, 1], strides = [1, 1]} : vector<8x20xf32> to vector<8x1xf32>
    %c19 = arith.constant 19 : index
    %c0_18 = arith.constant 0 : index
    %95 = vector.load %arg1[%c19, %c0_18] : memref<80x128xf32, #tpu.memory_space<vmem>>, vector<1x20xf32>
    %96 = vector.broadcast %94 : vector<8x1xf32> to vector<8x20xf32>
    %97 = vector.broadcast %95 : vector<1x20xf32> to vector<8x20xf32>
    %98 = arith.mulf %96, %97 : vector<8x20xf32>
    %99 = arith.addf %93, %98 : vector<8x20xf32>
    %100 = vector.extract_strided_slice %28 {offsets = [0, 12], sizes = [8, 1], strides = [1, 1]} : vector<8x20xf32> to vector<8x1xf32>
    %c20 = arith.constant 20 : index
    %c0_19 = arith.constant 0 : index
    %101 = vector.load %arg1[%c20, %c0_19] : memref<80x128xf32, #tpu.memory_space<vmem>>, vector<1x20xf32>
    %102 = vector.broadcast %100 : vector<8x1xf32> to vector<8x20xf32>
    %103 = vector.broadcast %101 : vector<1x20xf32> to vector<8x20xf32>
    %104 = arith.mulf %102, %103 : vector<8x20xf32>
    %105 = arith.addf %99, %104 : vector<8x20xf32>
    %106 = vector.extract_strided_slice %28 {offsets = [0, 13], sizes = [8, 1], strides = [1, 1]} : vector<8x20xf32> to vector<8x1xf32>
    %c21 = arith.constant 21 : index
    %c0_20 = arith.constant 0 : index
    %107 = vector.load %arg1[%c21, %c0_20] : memref<80x128xf32, #tpu.memory_space<vmem>>, vector<1x20xf32>
    %108 = vector.broadcast %106 : vector<8x1xf32> to vector<8x20xf32>
    %109 = vector.broadcast %107 : vector<1x20xf32> to vector<8x20xf32>
    %110 = arith.mulf %108, %109 : vector<8x20xf32>
    %111 = arith.addf %105, %110 : vector<8x20xf32>
    %112 = vector.extract_strided_slice %28 {offsets = [0, 14], sizes = [8, 1], strides = [1, 1]} : vector<8x20xf32> to vector<8x1xf32>
    %c22 = arith.constant 22 : index
    %c0_21 = arith.constant 0 : index
    %113 = vector.load %arg1[%c22, %c0_21] : memref<80x128xf32, #tpu.memory_space<vmem>>, vector<1x20xf32>
    %114 = vector.broadcast %112 : vector<8x1xf32> to vector<8x20xf32>
    %115 = vector.broadcast %113 : vector<1x20xf32> to vector<8x20xf32>
    %116 = arith.mulf %114, %115 : vector<8x20xf32>
    %117 = arith.addf %111, %116 : vector<8x20xf32>
    %118 = vector.extract_strided_slice %28 {offsets = [0, 15], sizes = [8, 1], strides = [1, 1]} : vector<8x20xf32> to vector<8x1xf32>
    %c23 = arith.constant 23 : index
    %c0_22 = arith.constant 0 : index
    %119 = vector.load %arg1[%c23, %c0_22] : memref<80x128xf32, #tpu.memory_space<vmem>>, vector<1x20xf32>
    %120 = vector.broadcast %118 : vector<8x1xf32> to vector<8x20xf32>
    %121 = vector.broadcast %119 : vector<1x20xf32> to vector<8x20xf32>
    %122 = arith.mulf %120, %121 : vector<8x20xf32>
    %123 = arith.addf %117, %122 : vector<8x20xf32>
    %124 = vector.extract_strided_slice %28 {offsets = [0, 16], sizes = [8, 1], strides = [1, 1]} : vector<8x20xf32> to vector<8x1xf32>
    %c24 = arith.constant 24 : index
    %c0_23 = arith.constant 0 : index
    %125 = vector.load %arg1[%c24, %c0_23] : memref<80x128xf32, #tpu.memory_space<vmem>>, vector<1x20xf32>
    %126 = vector.broadcast %124 : vector<8x1xf32> to vector<8x20xf32>
    %127 = vector.broadcast %125 : vector<1x20xf32> to vector<8x20xf32>
    %128 = arith.mulf %126, %127 : vector<8x20xf32>
    %129 = arith.addf %123, %128 : vector<8x20xf32>
    %130 = vector.extract_strided_slice %28 {offsets = [0, 17], sizes = [8, 1], strides = [1, 1]} : vector<8x20xf32> to vector<8x1xf32>
    %c25 = arith.constant 25 : index
    %c0_24 = arith.constant 0 : index
    %131 = vector.load %arg1[%c25, %c0_24] : memref<80x128xf32, #tpu.memory_space<vmem>>, vector<1x20xf32>
    %132 = vector.broadcast %130 : vector<8x1xf32> to vector<8x20xf32>
    %133 = vector.broadcast %131 : vector<1x20xf32> to vector<8x20xf32>
    %134 = arith.mulf %132, %133 : vector<8x20xf32>
    %135 = arith.addf %129, %134 : vector<8x20xf32>
    %136 = vector.extract_strided_slice %28 {offsets = [0, 18], sizes = [8, 1], strides = [1, 1]} : vector<8x20xf32> to vector<8x1xf32>
    %c26 = arith.constant 26 : index
    %c0_25 = arith.constant 0 : index
    %137 = vector.load %arg1[%c26, %c0_25] : memref<80x128xf32, #tpu.memory_space<vmem>>, vector<1x20xf32>
    %138 = vector.broadcast %136 : vector<8x1xf32> to vector<8x20xf32>
    %139 = vector.broadcast %137 : vector<1x20xf32> to vector<8x20xf32>
    %140 = arith.mulf %138, %139 : vector<8x20xf32>
    %141 = arith.addf %135, %140 : vector<8x20xf32>
    %142 = vector.extract_strided_slice %28 {offsets = [0, 19], sizes = [8, 1], strides = [1, 1]} : vector<8x20xf32> to vector<8x1xf32>
    %c27 = arith.constant 27 : index
    %c0_26 = arith.constant 0 : index
    %143 = vector.load %arg1[%c27, %c0_26] : memref<80x128xf32, #tpu.memory_space<vmem>>, vector<1x20xf32>
    %144 = vector.broadcast %142 : vector<8x1xf32> to vector<8x20xf32>
    %145 = vector.broadcast %143 : vector<1x20xf32> to vector<8x20xf32>
    %146 = arith.mulf %144, %145 : vector<8x20xf32>
    %147 = arith.addf %141, %146 : vector<8x20xf32>
    %cst_27 = arith.constant dense<0.000000e+00> : vector<20xf32>
    %148 = vector.multi_reduction <add>, %147, %cst_27 [0] : vector<8x20xf32> to vector<20xf32>
    %149 = vector.shape_cast %148 : vector<20xf32> to vector<1x20xf32>
    %150 = arith.mulf %147, %147 : vector<8x20xf32>
    %cst_28 = arith.constant dense<0.000000e+00> : vector<20xf32>
    %151 = vector.multi_reduction <add>, %150, %cst_28 [0] : vector<8x20xf32> to vector<20xf32>
    %152 = vector.shape_cast %151 : vector<20xf32> to vector<1x20xf32>
    %cst_29 = arith.constant 1.250000e-01 : f32
    %153 = vector.broadcast %cst_29 : f32 to vector<1x20xf32>
    %154 = arith.mulf %149, %153 : vector<1x20xf32>
    %cst_30 = arith.constant 1.250000e-01 : f32
    %155 = vector.broadcast %cst_30 : f32 to vector<1x20xf32>
    %156 = arith.mulf %152, %155 : vector<1x20xf32>
    %157 = arith.mulf %154, %154 : vector<1x20xf32>
    %158 = arith.subf %156, %157 : vector<1x20xf32>
    %cst_31 = arith.constant 0.000000e+00 : f32
    %159 = vector.broadcast %cst_31 : f32 to vector<1x20xf32>
    %160 = arith.maximumf %158, %159 : vector<1x20xf32>
    %c28 = arith.constant 28 : index
    %c0_32 = arith.constant 0 : index
    %161 = vector.load %arg1[%c28, %c0_32] : memref<80x128xf32, #tpu.memory_space<vmem>>, vector<1x20xf32>
    %cst_33 = arith.constant 9.99999974E-6 : f32
    %162 = vector.broadcast %cst_33 : f32 to vector<1x20xf32>
    %163 = arith.addf %160, %162 : vector<1x20xf32>
    %164 = math.rsqrt %163 : vector<1x20xf32>
    %165 = arith.mulf %161, %164 : vector<1x20xf32>
    %c29 = arith.constant 29 : index
    %c0_34 = arith.constant 0 : index
    %166 = vector.load %arg1[%c29, %c0_34] : memref<80x128xf32, #tpu.memory_space<vmem>>, vector<1x20xf32>
    %167 = arith.mulf %154, %165 : vector<1x20xf32>
    %168 = arith.subf %166, %167 : vector<1x20xf32>
    %169 = vector.broadcast %165 : vector<1x20xf32> to vector<8x20xf32>
    %170 = arith.mulf %147, %169 : vector<8x20xf32>
    %171 = vector.broadcast %168 : vector<1x20xf32> to vector<8x20xf32>
    %172 = arith.addf %170, %171 : vector<8x20xf32>
    %cst_35 = arith.constant 0.000000e+00 : f32
    %173 = vector.broadcast %cst_35 : f32 to vector<8x20xf32>
    %174 = arith.maximumf %172, %173 : vector<8x20xf32>
    %175 = vector.extract_strided_slice %174 {offsets = [0, 0], sizes = [8, 1], strides = [1, 1]} : vector<8x20xf32> to vector<8x1xf32>
    %c32 = arith.constant 32 : index
    %c0_36 = arith.constant 0 : index
    %176 = vector.load %arg1[%c32, %c0_36] : memref<80x128xf32, #tpu.memory_space<vmem>>, vector<1x20xf32>
    %177 = vector.broadcast %175 : vector<8x1xf32> to vector<8x20xf32>
    %178 = vector.broadcast %176 : vector<1x20xf32> to vector<8x20xf32>
    %179 = arith.mulf %177, %178 : vector<8x20xf32>
    %180 = vector.extract_strided_slice %174 {offsets = [0, 1], sizes = [8, 1], strides = [1, 1]} : vector<8x20xf32> to vector<8x1xf32>
    %c33 = arith.constant 33 : index
    %c0_37 = arith.constant 0 : index
    %181 = vector.load %arg1[%c33, %c0_37] : memref<80x128xf32, #tpu.memory_space<vmem>>, vector<1x20xf32>
    %182 = vector.broadcast %180 : vector<8x1xf32> to vector<8x20xf32>
    %183 = vector.broadcast %181 : vector<1x20xf32> to vector<8x20xf32>
    %184 = arith.mulf %182, %183 : vector<8x20xf32>
    %185 = arith.addf %179, %184 : vector<8x20xf32>
    %186 = vector.extract_strided_slice %174 {offsets = [0, 2], sizes = [8, 1], strides = [1, 1]} : vector<8x20xf32> to vector<8x1xf32>
    %c34 = arith.constant 34 : index
    %c0_38 = arith.constant 0 : index
    %187 = vector.load %arg1[%c34, %c0_38] : memref<80x128xf32, #tpu.memory_space<vmem>>, vector<1x20xf32>
    %188 = vector.broadcast %186 : vector<8x1xf32> to vector<8x20xf32>
    %189 = vector.broadcast %187 : vector<1x20xf32> to vector<8x20xf32>
    %190 = arith.mulf %188, %189 : vector<8x20xf32>
    %191 = arith.addf %185, %190 : vector<8x20xf32>
    %192 = vector.extract_strided_slice %174 {offsets = [0, 3], sizes = [8, 1], strides = [1, 1]} : vector<8x20xf32> to vector<8x1xf32>
    %c35 = arith.constant 35 : index
    %c0_39 = arith.constant 0 : index
    %193 = vector.load %arg1[%c35, %c0_39] : memref<80x128xf32, #tpu.memory_space<vmem>>, vector<1x20xf32>
    %194 = vector.broadcast %192 : vector<8x1xf32> to vector<8x20xf32>
    %195 = vector.broadcast %193 : vector<1x20xf32> to vector<8x20xf32>
    %196 = arith.mulf %194, %195 : vector<8x20xf32>
    %197 = arith.addf %191, %196 : vector<8x20xf32>
    %198 = vector.extract_strided_slice %174 {offsets = [0, 4], sizes = [8, 1], strides = [1, 1]} : vector<8x20xf32> to vector<8x1xf32>
    %c36 = arith.constant 36 : index
    %c0_40 = arith.constant 0 : index
    %199 = vector.load %arg1[%c36, %c0_40] : memref<80x128xf32, #tpu.memory_space<vmem>>, vector<1x20xf32>
    %200 = vector.broadcast %198 : vector<8x1xf32> to vector<8x20xf32>
    %201 = vector.broadcast %199 : vector<1x20xf32> to vector<8x20xf32>
    %202 = arith.mulf %200, %201 : vector<8x20xf32>
    %203 = arith.addf %197, %202 : vector<8x20xf32>
    %204 = vector.extract_strided_slice %174 {offsets = [0, 5], sizes = [8, 1], strides = [1, 1]} : vector<8x20xf32> to vector<8x1xf32>
    %c37 = arith.constant 37 : index
    %c0_41 = arith.constant 0 : index
    %205 = vector.load %arg1[%c37, %c0_41] : memref<80x128xf32, #tpu.memory_space<vmem>>, vector<1x20xf32>
    %206 = vector.broadcast %204 : vector<8x1xf32> to vector<8x20xf32>
    %207 = vector.broadcast %205 : vector<1x20xf32> to vector<8x20xf32>
    %208 = arith.mulf %206, %207 : vector<8x20xf32>
    %209 = arith.addf %203, %208 : vector<8x20xf32>
    %210 = vector.extract_strided_slice %174 {offsets = [0, 6], sizes = [8, 1], strides = [1, 1]} : vector<8x20xf32> to vector<8x1xf32>
    %c38 = arith.constant 38 : index
    %c0_42 = arith.constant 0 : index
    %211 = vector.load %arg1[%c38, %c0_42] : memref<80x128xf32, #tpu.memory_space<vmem>>, vector<1x20xf32>
    %212 = vector.broadcast %210 : vector<8x1xf32> to vector<8x20xf32>
    %213 = vector.broadcast %211 : vector<1x20xf32> to vector<8x20xf32>
    %214 = arith.mulf %212, %213 : vector<8x20xf32>
    %215 = arith.addf %209, %214 : vector<8x20xf32>
    %216 = vector.extract_strided_slice %174 {offsets = [0, 7], sizes = [8, 1], strides = [1, 1]} : vector<8x20xf32> to vector<8x1xf32>
    %c39 = arith.constant 39 : index
    %c0_43 = arith.constant 0 : index
    %217 = vector.load %arg1[%c39, %c0_43] : memref<80x128xf32, #tpu.memory_space<vmem>>, vector<1x20xf32>
    %218 = vector.broadcast %216 : vector<8x1xf32> to vector<8x20xf32>
    %219 = vector.broadcast %217 : vector<1x20xf32> to vector<8x20xf32>
    %220 = arith.mulf %218, %219 : vector<8x20xf32>
    %221 = arith.addf %215, %220 : vector<8x20xf32>
    %222 = vector.extract_strided_slice %174 {offsets = [0, 8], sizes = [8, 1], strides = [1, 1]} : vector<8x20xf32> to vector<8x1xf32>
    %c40 = arith.constant 40 : index
    %c0_44 = arith.constant 0 : index
    %223 = vector.load %arg1[%c40, %c0_44] : memref<80x128xf32, #tpu.memory_space<vmem>>, vector<1x20xf32>
    %224 = vector.broadcast %222 : vector<8x1xf32> to vector<8x20xf32>
    %225 = vector.broadcast %223 : vector<1x20xf32> to vector<8x20xf32>
    %226 = arith.mulf %224, %225 : vector<8x20xf32>
    %227 = arith.addf %221, %226 : vector<8x20xf32>
    %228 = vector.extract_strided_slice %174 {offsets = [0, 9], sizes = [8, 1], strides = [1, 1]} : vector<8x20xf32> to vector<8x1xf32>
    %c41 = arith.constant 41 : index
    %c0_45 = arith.constant 0 : index
    %229 = vector.load %arg1[%c41, %c0_45] : memref<80x128xf32, #tpu.memory_space<vmem>>, vector<1x20xf32>
    %230 = vector.broadcast %228 : vector<8x1xf32> to vector<8x20xf32>
    %231 = vector.broadcast %229 : vector<1x20xf32> to vector<8x20xf32>
    %232 = arith.mulf %230, %231 : vector<8x20xf32>
    %233 = arith.addf %227, %232 : vector<8x20xf32>
    %234 = vector.extract_strided_slice %174 {offsets = [0, 10], sizes = [8, 1], strides = [1, 1]} : vector<8x20xf32> to vector<8x1xf32>
    %c42 = arith.constant 42 : index
    %c0_46 = arith.constant 0 : index
    %235 = vector.load %arg1[%c42, %c0_46] : memref<80x128xf32, #tpu.memory_space<vmem>>, vector<1x20xf32>
    %236 = vector.broadcast %234 : vector<8x1xf32> to vector<8x20xf32>
    %237 = vector.broadcast %235 : vector<1x20xf32> to vector<8x20xf32>
    %238 = arith.mulf %236, %237 : vector<8x20xf32>
    %239 = arith.addf %233, %238 : vector<8x20xf32>
    %240 = vector.extract_strided_slice %174 {offsets = [0, 11], sizes = [8, 1], strides = [1, 1]} : vector<8x20xf32> to vector<8x1xf32>
    %c43 = arith.constant 43 : index
    %c0_47 = arith.constant 0 : index
    %241 = vector.load %arg1[%c43, %c0_47] : memref<80x128xf32, #tpu.memory_space<vmem>>, vector<1x20xf32>
    %242 = vector.broadcast %240 : vector<8x1xf32> to vector<8x20xf32>
    %243 = vector.broadcast %241 : vector<1x20xf32> to vector<8x20xf32>
    %244 = arith.mulf %242, %243 : vector<8x20xf32>
    %245 = arith.addf %239, %244 : vector<8x20xf32>
    %246 = vector.extract_strided_slice %174 {offsets = [0, 12], sizes = [8, 1], strides = [1, 1]} : vector<8x20xf32> to vector<8x1xf32>
    %c44 = arith.constant 44 : index
    %c0_48 = arith.constant 0 : index
    %247 = vector.load %arg1[%c44, %c0_48] : memref<80x128xf32, #tpu.memory_space<vmem>>, vector<1x20xf32>
    %248 = vector.broadcast %246 : vector<8x1xf32> to vector<8x20xf32>
    %249 = vector.broadcast %247 : vector<1x20xf32> to vector<8x20xf32>
    %250 = arith.mulf %248, %249 : vector<8x20xf32>
    %251 = arith.addf %245, %250 : vector<8x20xf32>
    %252 = vector.extract_strided_slice %174 {offsets = [0, 13], sizes = [8, 1], strides = [1, 1]} : vector<8x20xf32> to vector<8x1xf32>
    %c45 = arith.constant 45 : index
    %c0_49 = arith.constant 0 : index
    %253 = vector.load %arg1[%c45, %c0_49] : memref<80x128xf32, #tpu.memory_space<vmem>>, vector<1x20xf32>
    %254 = vector.broadcast %252 : vector<8x1xf32> to vector<8x20xf32>
    %255 = vector.broadcast %253 : vector<1x20xf32> to vector<8x20xf32>
    %256 = arith.mulf %254, %255 : vector<8x20xf32>
    %257 = arith.addf %251, %256 : vector<8x20xf32>
    %258 = vector.extract_strided_slice %174 {offsets = [0, 14], sizes = [8, 1], strides = [1, 1]} : vector<8x20xf32> to vector<8x1xf32>
    %c46 = arith.constant 46 : index
    %c0_50 = arith.constant 0 : index
    %259 = vector.load %arg1[%c46, %c0_50] : memref<80x128xf32, #tpu.memory_space<vmem>>, vector<1x20xf32>
    %260 = vector.broadcast %258 : vector<8x1xf32> to vector<8x20xf32>
    %261 = vector.broadcast %259 : vector<1x20xf32> to vector<8x20xf32>
    %262 = arith.mulf %260, %261 : vector<8x20xf32>
    %263 = arith.addf %257, %262 : vector<8x20xf32>
    %264 = vector.extract_strided_slice %174 {offsets = [0, 15], sizes = [8, 1], strides = [1, 1]} : vector<8x20xf32> to vector<8x1xf32>
    %c47 = arith.constant 47 : index
    %c0_51 = arith.constant 0 : index
    %265 = vector.load %arg1[%c47, %c0_51] : memref<80x128xf32, #tpu.memory_space<vmem>>, vector<1x20xf32>
    %266 = vector.broadcast %264 : vector<8x1xf32> to vector<8x20xf32>
    %267 = vector.broadcast %265 : vector<1x20xf32> to vector<8x20xf32>
    %268 = arith.mulf %266, %267 : vector<8x20xf32>
    %269 = arith.addf %263, %268 : vector<8x20xf32>
    %270 = vector.extract_strided_slice %174 {offsets = [0, 16], sizes = [8, 1], strides = [1, 1]} : vector<8x20xf32> to vector<8x1xf32>
    %c48 = arith.constant 48 : index
    %c0_52 = arith.constant 0 : index
    %271 = vector.load %arg1[%c48, %c0_52] : memref<80x128xf32, #tpu.memory_space<vmem>>, vector<1x20xf32>
    %272 = vector.broadcast %270 : vector<8x1xf32> to vector<8x20xf32>
    %273 = vector.broadcast %271 : vector<1x20xf32> to vector<8x20xf32>
    %274 = arith.mulf %272, %273 : vector<8x20xf32>
    %275 = arith.addf %269, %274 : vector<8x20xf32>
    %276 = vector.extract_strided_slice %174 {offsets = [0, 17], sizes = [8, 1], strides = [1, 1]} : vector<8x20xf32> to vector<8x1xf32>
    %c49 = arith.constant 49 : index
    %c0_53 = arith.constant 0 : index
    %277 = vector.load %arg1[%c49, %c0_53] : memref<80x128xf32, #tpu.memory_space<vmem>>, vector<1x20xf32>
    %278 = vector.broadcast %276 : vector<8x1xf32> to vector<8x20xf32>
    %279 = vector.broadcast %277 : vector<1x20xf32> to vector<8x20xf32>
    %280 = arith.mulf %278, %279 : vector<8x20xf32>
    %281 = arith.addf %275, %280 : vector<8x20xf32>
    %282 = vector.extract_strided_slice %174 {offsets = [0, 18], sizes = [8, 1], strides = [1, 1]} : vector<8x20xf32> to vector<8x1xf32>
    %c50 = arith.constant 50 : index
    %c0_54 = arith.constant 0 : index
    %283 = vector.load %arg1[%c50, %c0_54] : memref<80x128xf32, #tpu.memory_space<vmem>>, vector<1x20xf32>
    %284 = vector.broadcast %282 : vector<8x1xf32> to vector<8x20xf32>
    %285 = vector.broadcast %283 : vector<1x20xf32> to vector<8x20xf32>
    %286 = arith.mulf %284, %285 : vector<8x20xf32>
    %287 = arith.addf %281, %286 : vector<8x20xf32>
    %288 = vector.extract_strided_slice %174 {offsets = [0, 19], sizes = [8, 1], strides = [1, 1]} : vector<8x20xf32> to vector<8x1xf32>
    %c51 = arith.constant 51 : index
    %c0_55 = arith.constant 0 : index
    %289 = vector.load %arg1[%c51, %c0_55] : memref<80x128xf32, #tpu.memory_space<vmem>>, vector<1x20xf32>
    %290 = vector.broadcast %288 : vector<8x1xf32> to vector<8x20xf32>
    %291 = vector.broadcast %289 : vector<1x20xf32> to vector<8x20xf32>
    %292 = arith.mulf %290, %291 : vector<8x20xf32>
    %293 = arith.addf %287, %292 : vector<8x20xf32>
    %cst_56 = arith.constant dense<0.000000e+00> : vector<20xf32>
    %294 = vector.multi_reduction <add>, %293, %cst_56 [0] : vector<8x20xf32> to vector<20xf32>
    %295 = vector.shape_cast %294 : vector<20xf32> to vector<1x20xf32>
    %296 = arith.mulf %293, %293 : vector<8x20xf32>
    %cst_57 = arith.constant dense<0.000000e+00> : vector<20xf32>
    %297 = vector.multi_reduction <add>, %296, %cst_57 [0] : vector<8x20xf32> to vector<20xf32>
    %298 = vector.shape_cast %297 : vector<20xf32> to vector<1x20xf32>
    %cst_58 = arith.constant 1.250000e-01 : f32
    %299 = vector.broadcast %cst_58 : f32 to vector<1x20xf32>
    %300 = arith.mulf %295, %299 : vector<1x20xf32>
    %cst_59 = arith.constant 1.250000e-01 : f32
    %301 = vector.broadcast %cst_59 : f32 to vector<1x20xf32>
    %302 = arith.mulf %298, %301 : vector<1x20xf32>
    %303 = arith.mulf %300, %300 : vector<1x20xf32>
    %304 = arith.subf %302, %303 : vector<1x20xf32>
    %cst_60 = arith.constant 0.000000e+00 : f32
    %305 = vector.broadcast %cst_60 : f32 to vector<1x20xf32>
    %306 = arith.maximumf %304, %305 : vector<1x20xf32>
    %c52 = arith.constant 52 : index
    %c0_61 = arith.constant 0 : index
    %307 = vector.load %arg1[%c52, %c0_61] : memref<80x128xf32, #tpu.memory_space<vmem>>, vector<1x20xf32>
    %cst_62 = arith.constant 9.99999974E-6 : f32
    %308 = vector.broadcast %cst_62 : f32 to vector<1x20xf32>
    %309 = arith.addf %306, %308 : vector<1x20xf32>
    %310 = math.rsqrt %309 : vector<1x20xf32>
    %311 = arith.mulf %307, %310 : vector<1x20xf32>
    %c53 = arith.constant 53 : index
    %c0_63 = arith.constant 0 : index
    %312 = vector.load %arg1[%c53, %c0_63] : memref<80x128xf32, #tpu.memory_space<vmem>>, vector<1x20xf32>
    %313 = arith.mulf %300, %311 : vector<1x20xf32>
    %314 = arith.subf %312, %313 : vector<1x20xf32>
    %315 = vector.broadcast %311 : vector<1x20xf32> to vector<8x20xf32>
    %316 = arith.mulf %293, %315 : vector<8x20xf32>
    %317 = vector.broadcast %314 : vector<1x20xf32> to vector<8x20xf32>
    %318 = arith.addf %316, %317 : vector<8x20xf32>
    %cst_64 = arith.constant 0.000000e+00 : f32
    %319 = vector.broadcast %cst_64 : f32 to vector<8x20xf32>
    %320 = arith.maximumf %318, %319 : vector<8x20xf32>
    %321 = vector.extract_strided_slice %320 {offsets = [0, 0], sizes = [8, 1], strides = [1, 1]} : vector<8x20xf32> to vector<8x1xf32>
    %c56 = arith.constant 56 : index
    %c0_65 = arith.constant 0 : index
    %322 = vector.load %arg1[%c56, %c0_65] : memref<80x128xf32, #tpu.memory_space<vmem>>, vector<1x2xf32>
    %323 = vector.broadcast %321 : vector<8x1xf32> to vector<8x2xf32>
    %324 = vector.broadcast %322 : vector<1x2xf32> to vector<8x2xf32>
    %325 = arith.mulf %323, %324 : vector<8x2xf32>
    %326 = vector.extract_strided_slice %320 {offsets = [0, 1], sizes = [8, 1], strides = [1, 1]} : vector<8x20xf32> to vector<8x1xf32>
    %c57 = arith.constant 57 : index
    %c0_66 = arith.constant 0 : index
    %327 = vector.load %arg1[%c57, %c0_66] : memref<80x128xf32, #tpu.memory_space<vmem>>, vector<1x2xf32>
    %328 = vector.broadcast %326 : vector<8x1xf32> to vector<8x2xf32>
    %329 = vector.broadcast %327 : vector<1x2xf32> to vector<8x2xf32>
    %330 = arith.mulf %328, %329 : vector<8x2xf32>
    %331 = arith.addf %325, %330 : vector<8x2xf32>
    %332 = vector.extract_strided_slice %320 {offsets = [0, 2], sizes = [8, 1], strides = [1, 1]} : vector<8x20xf32> to vector<8x1xf32>
    %c58 = arith.constant 58 : index
    %c0_67 = arith.constant 0 : index
    %333 = vector.load %arg1[%c58, %c0_67] : memref<80x128xf32, #tpu.memory_space<vmem>>, vector<1x2xf32>
    %334 = vector.broadcast %332 : vector<8x1xf32> to vector<8x2xf32>
    %335 = vector.broadcast %333 : vector<1x2xf32> to vector<8x2xf32>
    %336 = arith.mulf %334, %335 : vector<8x2xf32>
    %337 = arith.addf %331, %336 : vector<8x2xf32>
    %338 = vector.extract_strided_slice %320 {offsets = [0, 3], sizes = [8, 1], strides = [1, 1]} : vector<8x20xf32> to vector<8x1xf32>
    %c59 = arith.constant 59 : index
    %c0_68 = arith.constant 0 : index
    %339 = vector.load %arg1[%c59, %c0_68] : memref<80x128xf32, #tpu.memory_space<vmem>>, vector<1x2xf32>
    %340 = vector.broadcast %338 : vector<8x1xf32> to vector<8x2xf32>
    %341 = vector.broadcast %339 : vector<1x2xf32> to vector<8x2xf32>
    %342 = arith.mulf %340, %341 : vector<8x2xf32>
    %343 = arith.addf %337, %342 : vector<8x2xf32>
    %344 = vector.extract_strided_slice %320 {offsets = [0, 4], sizes = [8, 1], strides = [1, 1]} : vector<8x20xf32> to vector<8x1xf32>
    %c60 = arith.constant 60 : index
    %c0_69 = arith.constant 0 : index
    %345 = vector.load %arg1[%c60, %c0_69] : memref<80x128xf32, #tpu.memory_space<vmem>>, vector<1x2xf32>
    %346 = vector.broadcast %344 : vector<8x1xf32> to vector<8x2xf32>
    %347 = vector.broadcast %345 : vector<1x2xf32> to vector<8x2xf32>
    %348 = arith.mulf %346, %347 : vector<8x2xf32>
    %349 = arith.addf %343, %348 : vector<8x2xf32>
    %350 = vector.extract_strided_slice %320 {offsets = [0, 5], sizes = [8, 1], strides = [1, 1]} : vector<8x20xf32> to vector<8x1xf32>
    %c61 = arith.constant 61 : index
    %c0_70 = arith.constant 0 : index
    %351 = vector.load %arg1[%c61, %c0_70] : memref<80x128xf32, #tpu.memory_space<vmem>>, vector<1x2xf32>
    %352 = vector.broadcast %350 : vector<8x1xf32> to vector<8x2xf32>
    %353 = vector.broadcast %351 : vector<1x2xf32> to vector<8x2xf32>
    %354 = arith.mulf %352, %353 : vector<8x2xf32>
    %355 = arith.addf %349, %354 : vector<8x2xf32>
    %356 = vector.extract_strided_slice %320 {offsets = [0, 6], sizes = [8, 1], strides = [1, 1]} : vector<8x20xf32> to vector<8x1xf32>
    %c62 = arith.constant 62 : index
    %c0_71 = arith.constant 0 : index
    %357 = vector.load %arg1[%c62, %c0_71] : memref<80x128xf32, #tpu.memory_space<vmem>>, vector<1x2xf32>
    %358 = vector.broadcast %356 : vector<8x1xf32> to vector<8x2xf32>
    %359 = vector.broadcast %357 : vector<1x2xf32> to vector<8x2xf32>
    %360 = arith.mulf %358, %359 : vector<8x2xf32>
    %361 = arith.addf %355, %360 : vector<8x2xf32>
    %362 = vector.extract_strided_slice %320 {offsets = [0, 7], sizes = [8, 1], strides = [1, 1]} : vector<8x20xf32> to vector<8x1xf32>
    %c63 = arith.constant 63 : index
    %c0_72 = arith.constant 0 : index
    %363 = vector.load %arg1[%c63, %c0_72] : memref<80x128xf32, #tpu.memory_space<vmem>>, vector<1x2xf32>
    %364 = vector.broadcast %362 : vector<8x1xf32> to vector<8x2xf32>
    %365 = vector.broadcast %363 : vector<1x2xf32> to vector<8x2xf32>
    %366 = arith.mulf %364, %365 : vector<8x2xf32>
    %367 = arith.addf %361, %366 : vector<8x2xf32>
    %368 = vector.extract_strided_slice %320 {offsets = [0, 8], sizes = [8, 1], strides = [1, 1]} : vector<8x20xf32> to vector<8x1xf32>
    %c64 = arith.constant 64 : index
    %c0_73 = arith.constant 0 : index
    %369 = vector.load %arg1[%c64, %c0_73] : memref<80x128xf32, #tpu.memory_space<vmem>>, vector<1x2xf32>
    %370 = vector.broadcast %368 : vector<8x1xf32> to vector<8x2xf32>
    %371 = vector.broadcast %369 : vector<1x2xf32> to vector<8x2xf32>
    %372 = arith.mulf %370, %371 : vector<8x2xf32>
    %373 = arith.addf %367, %372 : vector<8x2xf32>
    %374 = vector.extract_strided_slice %320 {offsets = [0, 9], sizes = [8, 1], strides = [1, 1]} : vector<8x20xf32> to vector<8x1xf32>
    %c65 = arith.constant 65 : index
    %c0_74 = arith.constant 0 : index
    %375 = vector.load %arg1[%c65, %c0_74] : memref<80x128xf32, #tpu.memory_space<vmem>>, vector<1x2xf32>
    %376 = vector.broadcast %374 : vector<8x1xf32> to vector<8x2xf32>
    %377 = vector.broadcast %375 : vector<1x2xf32> to vector<8x2xf32>
    %378 = arith.mulf %376, %377 : vector<8x2xf32>
    %379 = arith.addf %373, %378 : vector<8x2xf32>
    %380 = vector.extract_strided_slice %320 {offsets = [0, 10], sizes = [8, 1], strides = [1, 1]} : vector<8x20xf32> to vector<8x1xf32>
    %c66 = arith.constant 66 : index
    %c0_75 = arith.constant 0 : index
    %381 = vector.load %arg1[%c66, %c0_75] : memref<80x128xf32, #tpu.memory_space<vmem>>, vector<1x2xf32>
    %382 = vector.broadcast %380 : vector<8x1xf32> to vector<8x2xf32>
    %383 = vector.broadcast %381 : vector<1x2xf32> to vector<8x2xf32>
    %384 = arith.mulf %382, %383 : vector<8x2xf32>
    %385 = arith.addf %379, %384 : vector<8x2xf32>
    %386 = vector.extract_strided_slice %320 {offsets = [0, 11], sizes = [8, 1], strides = [1, 1]} : vector<8x20xf32> to vector<8x1xf32>
    %c67 = arith.constant 67 : index
    %c0_76 = arith.constant 0 : index
    %387 = vector.load %arg1[%c67, %c0_76] : memref<80x128xf32, #tpu.memory_space<vmem>>, vector<1x2xf32>
    %388 = vector.broadcast %386 : vector<8x1xf32> to vector<8x2xf32>
    %389 = vector.broadcast %387 : vector<1x2xf32> to vector<8x2xf32>
    %390 = arith.mulf %388, %389 : vector<8x2xf32>
    %391 = arith.addf %385, %390 : vector<8x2xf32>
    %392 = vector.extract_strided_slice %320 {offsets = [0, 12], sizes = [8, 1], strides = [1, 1]} : vector<8x20xf32> to vector<8x1xf32>
    %c68 = arith.constant 68 : index
    %c0_77 = arith.constant 0 : index
    %393 = vector.load %arg1[%c68, %c0_77] : memref<80x128xf32, #tpu.memory_space<vmem>>, vector<1x2xf32>
    %394 = vector.broadcast %392 : vector<8x1xf32> to vector<8x2xf32>
    %395 = vector.broadcast %393 : vector<1x2xf32> to vector<8x2xf32>
    %396 = arith.mulf %394, %395 : vector<8x2xf32>
    %397 = arith.addf %391, %396 : vector<8x2xf32>
    %398 = vector.extract_strided_slice %320 {offsets = [0, 13], sizes = [8, 1], strides = [1, 1]} : vector<8x20xf32> to vector<8x1xf32>
    %c69 = arith.constant 69 : index
    %c0_78 = arith.constant 0 : index
    %399 = vector.load %arg1[%c69, %c0_78] : memref<80x128xf32, #tpu.memory_space<vmem>>, vector<1x2xf32>
    %400 = vector.broadcast %398 : vector<8x1xf32> to vector<8x2xf32>
    %401 = vector.broadcast %399 : vector<1x2xf32> to vector<8x2xf32>
    %402 = arith.mulf %400, %401 : vector<8x2xf32>
    %403 = arith.addf %397, %402 : vector<8x2xf32>
    %404 = vector.extract_strided_slice %320 {offsets = [0, 14], sizes = [8, 1], strides = [1, 1]} : vector<8x20xf32> to vector<8x1xf32>
    %c70 = arith.constant 70 : index
    %c0_79 = arith.constant 0 : index
    %405 = vector.load %arg1[%c70, %c0_79] : memref<80x128xf32, #tpu.memory_space<vmem>>, vector<1x2xf32>
    %406 = vector.broadcast %404 : vector<8x1xf32> to vector<8x2xf32>
    %407 = vector.broadcast %405 : vector<1x2xf32> to vector<8x2xf32>
    %408 = arith.mulf %406, %407 : vector<8x2xf32>
    %409 = arith.addf %403, %408 : vector<8x2xf32>
    %410 = vector.extract_strided_slice %320 {offsets = [0, 15], sizes = [8, 1], strides = [1, 1]} : vector<8x20xf32> to vector<8x1xf32>
    %c71 = arith.constant 71 : index
    %c0_80 = arith.constant 0 : index
    %411 = vector.load %arg1[%c71, %c0_80] : memref<80x128xf32, #tpu.memory_space<vmem>>, vector<1x2xf32>
    %412 = vector.broadcast %410 : vector<8x1xf32> to vector<8x2xf32>
    %413 = vector.broadcast %411 : vector<1x2xf32> to vector<8x2xf32>
    %414 = arith.mulf %412, %413 : vector<8x2xf32>
    %415 = arith.addf %409, %414 : vector<8x2xf32>
    %416 = vector.extract_strided_slice %320 {offsets = [0, 16], sizes = [8, 1], strides = [1, 1]} : vector<8x20xf32> to vector<8x1xf32>
    %c72 = arith.constant 72 : index
    %c0_81 = arith.constant 0 : index
    %417 = vector.load %arg1[%c72, %c0_81] : memref<80x128xf32, #tpu.memory_space<vmem>>, vector<1x2xf32>
    %418 = vector.broadcast %416 : vector<8x1xf32> to vector<8x2xf32>
    %419 = vector.broadcast %417 : vector<1x2xf32> to vector<8x2xf32>
    %420 = arith.mulf %418, %419 : vector<8x2xf32>
    %421 = arith.addf %415, %420 : vector<8x2xf32>
    %422 = vector.extract_strided_slice %320 {offsets = [0, 17], sizes = [8, 1], strides = [1, 1]} : vector<8x20xf32> to vector<8x1xf32>
    %c73 = arith.constant 73 : index
    %c0_82 = arith.constant 0 : index
    %423 = vector.load %arg1[%c73, %c0_82] : memref<80x128xf32, #tpu.memory_space<vmem>>, vector<1x2xf32>
    %424 = vector.broadcast %422 : vector<8x1xf32> to vector<8x2xf32>
    %425 = vector.broadcast %423 : vector<1x2xf32> to vector<8x2xf32>
    %426 = arith.mulf %424, %425 : vector<8x2xf32>
    %427 = arith.addf %421, %426 : vector<8x2xf32>
    %428 = vector.extract_strided_slice %320 {offsets = [0, 18], sizes = [8, 1], strides = [1, 1]} : vector<8x20xf32> to vector<8x1xf32>
    %c74 = arith.constant 74 : index
    %c0_83 = arith.constant 0 : index
    %429 = vector.load %arg1[%c74, %c0_83] : memref<80x128xf32, #tpu.memory_space<vmem>>, vector<1x2xf32>
    %430 = vector.broadcast %428 : vector<8x1xf32> to vector<8x2xf32>
    %431 = vector.broadcast %429 : vector<1x2xf32> to vector<8x2xf32>
    %432 = arith.mulf %430, %431 : vector<8x2xf32>
    %433 = arith.addf %427, %432 : vector<8x2xf32>
    %434 = vector.extract_strided_slice %320 {offsets = [0, 19], sizes = [8, 1], strides = [1, 1]} : vector<8x20xf32> to vector<8x1xf32>
    %c75 = arith.constant 75 : index
    %c0_84 = arith.constant 0 : index
    %435 = vector.load %arg1[%c75, %c0_84] : memref<80x128xf32, #tpu.memory_space<vmem>>, vector<1x2xf32>
    %436 = vector.broadcast %434 : vector<8x1xf32> to vector<8x2xf32>
    %437 = vector.broadcast %435 : vector<1x2xf32> to vector<8x2xf32>
    %438 = arith.mulf %436, %437 : vector<8x2xf32>
    %439 = arith.addf %433, %438 : vector<8x2xf32>
    %c76 = arith.constant 76 : index
    %c0_85 = arith.constant 0 : index
    %440 = vector.load %arg1[%c76, %c0_85] : memref<80x128xf32, #tpu.memory_space<vmem>>, vector<1x2xf32>
    %441 = vector.broadcast %440 : vector<1x2xf32> to vector<8x2xf32>
    %442 = arith.addf %439, %441 : vector<8x2xf32>
    %c0_86 = arith.constant 0 : index
    %c0_87 = arith.constant 0 : index
    %443 = vector.load %arg2[%c0_86, %c0_87] : memref<8x2xf32, #tpu.memory_space<vmem>>, vector<8x2xf32>
    tpu.vector_store %arg2[%c0_86, %c0_87], %442 {strides = array<i32>} : memref<8x2xf32, #tpu.memory_space<vmem>>, vector<8x2xf32>,
    return
  }
}

</mosaic_0001>

<bundles_post_ra>
// kernel: net_forward.1
= control target key start
LH: loop header
LB: loop body
LE: loop exit
PB: predicated region body
PF: predicated region fallthrough
CT: control target
= control target key end

     0   :  { %7 = vsyncpa [#allocation3], 0  ;;  %s1008_s9 = smov [#allocation2]   ;;  %s1138_s0 = inlined_call_operand.vmem [shape: f32[8,4], index: 0, kind: input, shape index: {}]   ;;  %s1139_s1 = inlined_call_operand.hbm [shape: f32[80,128], index: 1, kind: input, shape index: {}]   ;;  %s1140_s2 = inlined_call_operand.vmem [shape: f32[8,2], index: 2, kind: output, shape index: {}]  }
   0x1   :  { %s15_s10 = sshll.u32 %s1008_s9, 4  ;;  %s984_s13 = scalar_lea.hbm %s1139_s1, 1280  ;;  %s16_s10 = int_to_ptr.vmem [resolvable:$true] %s15_s10 }
   0x2   :  { %p985_p0 = scmp.ne.s32.totalorder %s1139_s1, %s984_s13  ;;  %p988_p1 = scmp.lt.u32.totalorder %s984_s13, %s1139_s1 }
   0x4   :  { %p990_p2 = pnand %p988_p1, %p985_p0 }
   0x6   :  { %993 = shalt.err (!%p990_p2)
}
   0x7   :  { %s994_s18 = scalar_lea.vmem %s16_s10, 1280  ;;  %p999_p4 = scmp.lt.s32.totalorder %s16_s10, %s16_s10 }
   0x8   :  { %p995_p3 = scmp.ne.s32.totalorder %s16_s10, %s994_s18  ;;  %p1000_p5 = scmp.lt.s32.totalorder %s994_s18, %s994_s18 }
   0xa   :  { %p1001_p6 = por %p1000_p5, %p999_p4 }
   0xc   :  { %p1002_p7 = pnand %p1001_p6, %p995_p3 }
   0xe   :  { %1005 = shalt.err (!%p1002_p7)
}
   0xf   :  { %s1009_s19 = smov 128   ;;  %s1010_s20 = smov 8  }
  0x10   :  { %21 = dma.hbm_to_vmem [thread:$0]  %s1139_s1, 1280, %s16_s10, [#allocation3], %s1009_s19, %s1009_s19, %s1010_s20  }
  0x11   :  { %1006 = dma.done.wait [#allocation3], 1280  }
  0x12   :  { %1007 = vsyncadd [#allocation3], 4294966016  ;;  %v1011_v0 = vmov 0   ;;  %v1012_v1 = vmov 2   ;;  %v25_v2 = vld [vmem:[%s1138_s0] sm:$0xff]  ;;  %v1013_v3 = vmov 1  }
  0x13   :  { %916 = vset.pattern.permute.xlu0 %v1011_v0  ;;  %918 = vset.pattern.permute.xlu1 %v1012_v1  ;;  %v1014_v4 = vmov 3   ;;  %v827_v7 = vld [vmem:[#allocation2] ss:$0 sm:$0xff]  ;;  %v828_v8 = vld [vmem:[#allocation2 + $0x1] ss:$0 sm:$0xff]  ;;  %v1015_v23 = vmov 6  }
  0x14   :  { %29 = vperm.xlu0 %916, %v25_v2   ;;  %50 = vperm.xlu1 %918, %v25_v2   ;;  %v829_v9 = vld [vmem:[#allocation2 + $0x2] ss:$0 sm:$0xff]  ;;  %v830_v11 = vld [vmem:[#allocation2 + $0x3] ss:$0 sm:$0xff]  ;;  %v831_v19 = vld [vmem:[#allocation2 + $0x4] ss:$0 sm:$0xff] }
  0x15   :  { %v1016_v24 = vmov 4   ;;  %v1017_v25 = vmov 9   ;;  %v1018_v26 = vmov 5   ;;  %v1019_v27 = vmov 12   ;;  %v833_v39 = vld [vmem:[#allocation2 + $0x9] ss:$0 sm:$0xff] }
  0x16   :  { %v1020_v28 = vmov 7   ;;  %v1021_v29 = vmov 15   ;;  %v1022_v30 = vmov 8   ;;  %v1023_v31 = vmov 18   ;;  %v832_v40 = vld [vmem:[#allocation2 + $0x8] ss:$0 sm:$0xff] }
  0x17   :  { %v1024_v32 = vmov 10   ;;  %v1025_v33 = vmov 11   ;;  %v1026_v34 = vmov 13   ;;  %v1027_v35 = vmov 14   ;;  %v834_v45 = vld [vmem:[#allocation2 + $0xa] ss:$0 sm:$0xff] }
  0x18   :  { %917 = vset.pattern.permute.xlu0 %v1013_v3  ;;  %919 = vset.pattern.permute.xlu1 %v1014_v4  ;;  %v1028_v36 = vmov 16   ;;  %v1029_v37 = vmov 17   ;;  %v1030_v38 = vmov 19   ;;  %v835_v49 = vld [vmem:[#allocation2 + $0xb] ss:$0 sm:$0xff]  ;;  %vm297_vm0 = vcmask 162816  }
  0x19   :  { %39 = vperm.xlu0 %917, %v25_v2   ;;  %61 = vperm.xlu1 %919, %v25_v2   ;;  %v836_v52 = vld [vmem:[#allocation2 + $0xc] ss:$0 sm:$0xff]  ;;  %v837_v57 = vld [vmem:[#allocation2 + $0xd] ss:$0 sm:$0xff]  ;;  %v838_v61 = vld [vmem:[#allocation2 + $0xe] ss:$0 sm:$0xff] }
  0x1a   :  { %v839_v2 = vld [vmem:[#allocation2 + $0xf] ss:$0 sm:$0xff]  ;;  %vm820_vm1 = vcmask 15360  }
  0x1d   :  { %920 = vset.pattern.permute.xlu1 %v1011_v0 }
  0x93   :  { %v30_v5 = vpop.permute.xlu0 %29  ;;  %v51_v6 = vpop.permute.xlu1 %50 }
  0x94   :  { %v36_v13 = vmul.f32 %v827_v7, %v30_v5  ;;  %v57_v15 = vmul.f32 %v829_v9, %v51_v6  ;;  %v840_v9 = vld [vmem:[#allocation2 + $0x10] ss:$0 sm:$0xff] }
  0x98   :  { %v40_v10 = vpop.permute.xlu0 %39  ;;  %v62_v12 = vpop.permute.xlu1 %61 }
  0x99   :  { %v46_v14 = vmul.f32 %v828_v8, %v40_v10  ;;  %v68_v17 = vmul.f32 %v830_v11, %v62_v12 }
  0x9b   :  { %v47_v16 = vadd.f32 %v46_v14, %v36_v13  ;;  %v841_v13 = vld [vmem:[#allocation2 + $0x11] ss:$0 sm:$0xff] }
  0x9d   :  { %v58_v18 = vadd.f32 %v57_v15, %v47_v16  ;;  %v842_v16 = vld [vmem:[#allocation2 + $0x12] ss:$0 sm:$0xff] }
  0x9f   :  { %v69_v20 = vadd.f32 %v68_v17, %v58_v18 }
  0xa1   :  { %v75_v21 = vadd.f32 %v831_v19, %v69_v20 }
  0xa3   :  { %v76_v22 = vmax.f32 %v75_v21, 0.0  ;;  %v843_v21 = vld [vmem:[#allocation2 + $0x13] ss:$0 sm:$0xff] }
  0xa5   :  { %90 = vperm.xlu0 %917, %v76_v22   ;;  %80 = vperm.xlu1 %920, %v76_v22  }
  0xa9   :  { %922 = vset.pattern.permute.xlu0 %v1014_v4  ;;  %921 = vset.pattern.permute.xlu1 %v1012_v1 }
  0xaa   :  { %112 = vperm.xlu0 %922, %v76_v22   ;;  %101 = vperm.xlu1 %921, %v76_v22  }
  0xae   :  { %925 = vset.pattern.permute.xlu0 %v1015_v23  ;;  %923 = vset.pattern.permute.xlu1 %v1016_v24 }
  0xaf   :  { %145 = vperm.xlu0 %925, %v76_v22   ;;  %123 = vperm.xlu1 %923, %v76_v22  }
  0xb3   :  { %928 = vset.pattern.permute.xlu0 %v1017_v25  ;;  %924 = vset.pattern.permute.xlu1 %v1018_v26 }
  0xb4   :  { %178 = vperm.xlu0 %928, %v76_v22   ;;  %134 = vperm.xlu1 %924, %v76_v22  }
  0xb8   :  { %931 = vset.pattern.permute.xlu0 %v1019_v27  ;;  %926 = vset.pattern.permute.xlu1 %v1020_v28 }
  0xb9   :  { %211 = vperm.xlu0 %931, %v76_v22   ;;  %156 = vperm.xlu1 %926, %v76_v22  }
  0xbd   :  { %934 = vset.pattern.permute.xlu0 %v1021_v29  ;;  %927 = vset.pattern.permute.xlu1 %v1022_v30 }
  0xbe   :  { %244 = vperm.xlu0 %934, %v76_v22   ;;  %167 = vperm.xlu1 %927, %v76_v22  }
  0xc2   :  { %937 = vset.pattern.permute.xlu0 %v1023_v31  ;;  %929 = vset.pattern.permute.xlu1 %v1024_v32 }
  0xc3   :  { %277 = vperm.xlu0 %937, %v76_v22   ;;  %189 = vperm.xlu1 %929, %v76_v22  }
  0xc7   :  { %930 = vset.pattern.permute.xlu1 %v1025_v33  ;;  %940 = vset.pattern.permute.xlu0 %v1013_v3 }
  0xc8   :  { %200 = vperm.xlu1 %930, %v76_v22  }
  0xcc   :  { %932 = vset.pattern.permute.xlu1 %v1026_v34 }
  0xcd   :  { %222 = vperm.xlu1 %932, %v76_v22  }
  0xd1   :  { %933 = vset.pattern.permute.xlu1 %v1027_v35 }
  0xd2   :  { %233 = vperm.xlu1 %933, %v76_v22  }
  0xd6   :  { %935 = vset.pattern.permute.xlu1 %v1028_v36 }
  0xd7   :  { %255 = vperm.xlu1 %935, %v76_v22  }
  0xdb   :  { %936 = vset.pattern.permute.xlu1 %v1029_v37 }
  0xdc   :  { %266 = vperm.xlu1 %936, %v76_v22  }
  0xe0   :  { %938 = vset.pattern.permute.xlu1 %v1030_v38 }
  0xe1   :  { %288 = vperm.xlu1 %938, %v76_v22  }
  0xe5   :  { %939 = vset.pattern.permute.xlu1 %v1011_v0 }
 0x124   :  { %v91_v41 = vpop.permute.xlu0 %90  ;;  %v81_v42 = vpop.permute.xlu1 %80 }
 0x125   :  { %v97_v43 = vmul.f32 %v833_v39, %v91_v41  ;;  %v87_v44 = vmul.f32 %v832_v40, %v81_v42  ;;  %v844_v41 = vld [vmem:[#allocation2 + $0x14] ss:$0 sm:$0xff] }
 0x127   :  { %v98_v47 = vadd.f32 %v97_v43, %v87_v44  ;;  %v845_v44 = vld [vmem:[#allocation2 + $0x15] ss:$0 sm:$0xff] }
 0x129   :  { %v102_v46 = vpop.permute.xlu1 %101  ;;  %v113_v50 = vpop.permute.xlu0 %112 }
 0x12a   :  { %v108_v48 = vmul.f32 %v834_v45, %v102_v46  ;;  %v119_v53 = vmul.f32 %v835_v49, %v113_v50  ;;  %v846_v49 = vld [vmem:[#allocation2 + $0x16] ss:$0 sm:$0xff] }
 0x12c   :  { %v109_v51 = vadd.f32 %v108_v48, %v98_v47 }
 0x12e   :  { %v124_v54 = vpop.permute.xlu1 %123  ;;  %v120_v55 = vadd.f32 %v119_v53, %v109_v51  ;;  %v146_v62 = vpop.permute.xlu0 %145  ;;  %v847_v53 = vld [vmem:[#allocation2 + $0x17] ss:$0 sm:$0xff] }
 0x12f   :  { %v130_v56 = vmul.f32 %v836_v52, %v124_v54  ;;  %v152_v5 = vmul.f32 %v838_v61, %v146_v62  ;;  %v849_v61 = vld [vmem:[#allocation2 + $0x19] ss:$0 sm:$0xff]  ;;  %v850_v62 = vld [vmem:[#allocation2 + $0x1a] ss:$0 sm:$0xff] }
 0x131   :  { %v131_v59 = vadd.f32 %v130_v56, %v120_v55  ;;  %v848_v56 = vld [vmem:[#allocation2 + $0x18] ss:$0 sm:$0xff] }
 0x133   :  { %v135_v58 = vpop.permute.xlu1 %134  ;;  %v179_v14 = vpop.permute.xlu0 %178 }
 0x134   :  { %v141_v60 = vmul.f32 %v837_v57, %v135_v58  ;;  %v185_v17 = vmul.f32 %v841_v13, %v179_v14 }
 0x136   :  { %v142_v63 = vadd.f32 %v141_v60, %v131_v59 }
 0x138   :  { %v157_v6 = vpop.permute.xlu1 %156  ;;  %v153_v7 = vadd.f32 %v152_v5, %v142_v63  ;;  %v212_v42 = vpop.permute.xlu0 %211 }
 0x139   :  { %v163_v8 = vmul.f32 %v839_v2, %v157_v6  ;;  %v218_v45 = vmul.f32 %v844_v41, %v212_v42 }
 0x13b   :  { %v164_v11 = vadd.f32 %v163_v8, %v153_v7 }
 0x13d   :  { %v168_v10 = vpop.permute.xlu1 %167  ;;  %v245_v54 = vpop.permute.xlu0 %244 }
 0x13e   :  { %v174_v12 = vmul.f32 %v840_v9, %v168_v10  ;;  %v251_v57 = vmul.f32 %v847_v53, %v245_v54  ;;  %v851_v9 = vld [vmem:[#allocation2 + $0x1b] ss:$0 sm:$0xff]  ;;  %v318_v53 = vld [vmem:[#allocation2 + $0x1c] sm:$0x1] }
 0x140   :  { %v175_v15 = vadd.f32 %v174_v12, %v164_v11 }
 0x142   :  { %v190_v18 = vpop.permute.xlu1 %189  ;;  %v186_v19 = vadd.f32 %v185_v17, %v175_v15  ;;  %v278_v63 = vpop.permute.xlu0 %277 }
 0x143   :  { %v196_v20 = vmul.f32 %v842_v16, %v190_v18  ;;  %v284_v7 = vmul.f32 %v850_v62, %v278_v63 }
 0x145   :  { %v197_v39 = vadd.f32 %v196_v20, %v186_v19 }
 0x147   :  { %v201_v22 = vpop.permute.xlu1 %200 }
 0x148   :  { %v207_v40 = vmul.f32 %v843_v21, %v201_v22 }
 0x14a   :  { %v208_v43 = vadd.f32 %v207_v40, %v197_v39 }
 0x14c   :  { %v223_v46 = vpop.permute.xlu1 %222  ;;  %v219_v47 = vadd.f32 %v218_v45, %v208_v43 }
 0x14d   :  { %v229_v48 = vmul.f32 %v845_v44, %v223_v46 }
 0x14f   :  { %v230_v51 = vadd.f32 %v229_v48, %v219_v47 }
 0x151   :  { %v234_v50 = vpop.permute.xlu1 %233 }
 0x152   :  { %v240_v52 = vmul.f32 %v846_v49, %v234_v50 }
 0x154   :  { %v241_v55 = vadd.f32 %v240_v52, %v230_v51  ;;  %v325_v51 = vlaneseq }
 0x156   :  { %v256_v58 = vpop.permute.xlu1 %255  ;;  %v252_v59 = vadd.f32 %v251_v57, %v241_v55  ;;  %v326_v52 = vshrl.u32 %v325_v51, 7  ;;  %v322_v57 = vld [vmem:[#allocation2 + $0x1d] sm:$0x1] }
 0x157   :  { %v262_v60 = vmul.f32 %v848_v56, %v256_v58 }
 0x158   :  { %v1088_v54 = vsub.s32 0, %v326_v52 }
 0x159   :  { %v263_v5 = vadd.f32 %v262_v60, %v252_v59 }
 0x15b   :  { %v267_v2 = vpop.permute.xlu1 %266 }
 0x15c   :  { %v273_v6 = vmul.f32 %v849_v61, %v267_v2 }
 0x15e   :  { %v274_v8 = vadd.f32 %v273_v6, %v263_v5 }
 0x160   :  { %v285_v10 = vadd.f32 %v284_v7, %v274_v8  ;;  %v289_v11 = vpop.permute.xlu1 %288  ;;  %v852_v7 = vld [vmem:[#allocation2 + $0x20] ss:$0 sm:$0xff]  ;;  %v854_v8 = vld [vmem:[#allocation2 + $0x22] ss:$0 sm:$0xff] }
 0x161   :  { %v295_v12 = vmul.f32 %v851_v9, %v289_v11 }
 0x163   :  { %v296_v13 = vadd.f32 %v295_v12, %v285_v10 }
 0x165   :  { %v298_v14 = vsel %vm297_vm0, %v296_v13, 0.0  ;;  %v305_v15 = vmul.f32 %v296_v13, %v296_v13 }
 0x166   :  { %v299_v16 = vrot.slane %v298_v14, 4 }
 0x167   :  { %v306_v17 = vsel %vm297_vm0, %v305_v15, 0.0 }
 0x168   :  { %v300_v18 = vadd.f32 %v299_v16, %v298_v14  ;;  %v307_v19 = vrot.slane %v306_v17, 4 }
 0x16a   :  { %v301_v20 = vrot.slane %v300_v18, 2  ;;  %v308_v21 = vadd.f32 %v307_v19, %v306_v17 }
 0x16c   :  { %v302_v22 = vadd.f32 %v301_v20, %v300_v18  ;;  %v309_v39 = vrot.slane %v308_v21, 2  ;;  %v856_v18 = vld [vmem:[#allocation2 + $0x24] ss:$0 sm:$0xff] }
 0x16e   :  { %v303_v40 = vrot.slane %v302_v22, 1  ;;  %v310_v41 = vadd.f32 %v309_v39, %v308_v21  ;;  %v857_v21 = vld [vmem:[#allocation2 + $0x25] ss:$0 sm:$0xff] }
 0x170   :  { %v304_v42 = vadd.f32 %v303_v40, %v302_v22  ;;  %v311_v43 = vrot.slane %v310_v41, 1 }
 0x172   :  { %v312_v44 = vadd.f32 %v311_v43, %v310_v41  ;;  %v313_v45 = vmul.f32 0.125, %v304_v42  ;;  %v858_v41 = vld [vmem:[#allocation2 + $0x26] ss:$0 sm:$0xff] }
 0x174   :  { %v314_v46 = vmul.f32 0.125, %v312_v44  ;;  %v315_v47 = vmul.f32 %v313_v45, %v313_v45 }
 0x176   :  { %v316_v48 = vsub.f32 %v314_v46, %v315_v47 }
 0x178   :  { %v317_v49 = vmax.f32 %v316_v48, 0.0  ;;  %v860_v48 = vld [vmem:[#allocation2 + $0x28] ss:$0 sm:$0xff] }
 0x17a   :  { %v319_v50 = vadd.f32 1e-05, %v317_v49 }
 0x17c   :  { %980 = vrsqrt.f32 %v319_v50 }
 0x186   :  { %v981_v55 = vpop.eup %980 }
 0x187   :  { %v321_v56 = vmul.f32 %v981_v55, %v318_v53  ;;  %v861_v53 = vld [vmem:[#allocation2 + $0x29] ss:$0 sm:$0xff] }
 0x189   :  { %v323_v58 = vmul.f32 %v321_v56, %v313_v45  ;;  %v328_v59 = vrot.slane %v321_v56, %v1088_v54  ;;  %v859_v45 = vld [vmem:[#allocation2 + $0x27] ss:$0 sm:$0xff] }
 0x18b   :  { %v324_v60 = vsub.f32 %v322_v57, %v323_v58  ;;  %v329_v61 = vmul.f32 %v328_v59, %v296_v13  ;;  %v855_v13 = vld [vmem:[#allocation2 + $0x23] ss:$0 sm:$0xff]  ;;  %v862_v58 = vld [vmem:[#allocation2 + $0x2a] ss:$0 sm:$0xff] }
 0x18d   :  { %v333_v62 = vrot.slane %v324_v60, %v1088_v54 }
 0x18f   :  { %v334_v63 = vadd.f32 %v333_v62, %v329_v61  ;;  %v863_v61 = vld [vmem:[#allocation2 + $0x2b] ss:$0 sm:$0xff] }
 0x191   :  { %v335_v2 = vmax.f32 %v334_v63, 0.0 }
 0x193   :  { %349 = vperm.xlu0 %940, %v335_v2   ;;  %339 = vperm.xlu1 %939, %v335_v2  }
 0x197   :  { %943 = vset.pattern.permute.xlu0 %v1016_v24  ;;  %941 = vset.pattern.permute.xlu1 %v1012_v1 }
 0x198   :  { %382 = vperm.xlu0 %943, %v335_v2   ;;  %360 = vperm.xlu1 %941, %v335_v2  }
 0x19c   :  { %946 = vset.pattern.permute.xlu0 %v1020_v28  ;;  %942 = vset.pattern.permute.xlu1 %v1014_v4 }
 0x19d   :  { %415 = vperm.xlu0 %946, %v335_v2   ;;  %371 = vperm.xlu1 %942, %v335_v2  }
 0x1a1   :  { %949 = vset.pattern.permute.xlu0 %v1024_v32  ;;  %944 = vset.pattern.permute.xlu1 %v1018_v26 }
 0x1a2   :  { %448 = vperm.xlu0 %949, %v335_v2   ;;  %393 = vperm.xlu1 %944, %v335_v2  }
 0x1a6   :  { %952 = vset.pattern.permute.xlu0 %v1026_v34  ;;  %945 = vset.pattern.permute.xlu1 %v1015_v23 }
 0x1a7   :  { %481 = vperm.xlu0 %952, %v335_v2   ;;  %404 = vperm.xlu1 %945, %v335_v2  }
 0x1ab   :  { %955 = vset.pattern.permute.xlu0 %v1028_v36  ;;  %947 = vset.pattern.permute.xlu1 %v1022_v30 }
 0x1ac   :  { %514 = vperm.xlu0 %955, %v335_v2   ;;  %426 = vperm.xlu1 %947, %v335_v2  }
 0x1b0   :  { %958 = vset.pattern.permute.xlu0 %v1030_v38  ;;  %948 = vset.pattern.permute.xlu1 %v1017_v25 }
 0x1b1   :  { %547 = vperm.xlu0 %958, %v335_v2   ;;  %437 = vperm.xlu1 %948, %v335_v2  }
 0x1b5   :  { %950 = vset.pattern.permute.xlu1 %v1025_v33  ;;  %961 = vset.pattern.permute.xlu0 %v1012_v1  ;;  %v853_v1 = vld [vmem:[#allocation2 + $0x21] ss:$0 sm:$0xff] }
 0x1b6   :  { %459 = vperm.xlu1 %950, %v335_v2  }
 0x1ba   :  { %951 = vset.pattern.permute.xlu1 %v1019_v27 }
 0x1bb   :  { %470 = vperm.xlu1 %951, %v335_v2  }
 0x1bf   :  { %953 = vset.pattern.permute.xlu1 %v1027_v35 }
 0x1c0   :  { %492 = vperm.xlu1 %953, %v335_v2  }
 0x1c4   :  { %954 = vset.pattern.permute.xlu1 %v1021_v29 }
 0x1c5   :  { %503 = vperm.xlu1 %954, %v335_v2  }
 0x1c9   :  { %956 = vset.pattern.permute.xlu1 %v1029_v37 }
 0x1ca   :  { %525 = vperm.xlu1 %956, %v335_v2  }
 0x1ce   :  { %957 = vset.pattern.permute.xlu1 %v1023_v31 }
 0x1cf   :  { %536 = vperm.xlu1 %957, %v335_v2  }
 0x1d3   :  { %959 = vset.pattern.permute.xlu1 %v1011_v0 }
 0x212   :  { %v340_v5 = vpop.permute.xlu1 %339  ;;  %v350_v6 = vpop.permute.xlu0 %349 }
 0x213   :  { %v356_v9 = vmul.f32 %v853_v1, %v350_v6  ;;  %v346_v10 = vmul.f32 %v852_v7, %v340_v5  ;;  %v864_v1 = vld [vmem:[#allocation2 + $0x2c] ss:$0 sm:$0xff] }
 0x215   :  { %v357_v14 = vadd.f32 %v356_v9, %v346_v10  ;;  %v865_v9 = vld [vmem:[#allocation2 + $0x2d] ss:$0 sm:$0xff] }
 0x217   :  { %v361_v11 = vpop.permute.xlu1 %360  ;;  %v383_v19 = vpop.permute.xlu0 %382 }
 0x218   :  { %v367_v12 = vmul.f32 %v854_v8, %v361_v11  ;;  %v389_v22 = vmul.f32 %v856_v18, %v383_v19 }
 0x21a   :  { %v368_v16 = vadd.f32 %v367_v12, %v357_v14  ;;  %v866_v12 = vld [vmem:[#allocation2 + $0x2e] ss:$0 sm:$0xff] }
 0x21c   :  { %v372_v15 = vpop.permute.xlu1 %371  ;;  %v416_v46 = vpop.permute.xlu0 %415 }
 0x21d   :  { %v378_v17 = vmul.f32 %v855_v13, %v372_v15  ;;  %v422_v49 = vmul.f32 %v859_v45, %v416_v46  ;;  %v871_v45 = vld [vmem:[#allocation2 + $0x33] ss:$0 sm:$0xff] }
 0x21f   :  { %v379_v20 = vadd.f32 %v378_v17, %v368_v16  ;;  %v867_v17 = vld [vmem:[#allocation2 + $0x2f] ss:$0 sm:$0xff] }
 0x221   :  { %v394_v0 = vpop.permute.xlu1 %393  ;;  %v390_v39 = vadd.f32 %v389_v22, %v379_v20  ;;  %v449_v59 = vpop.permute.xlu0 %448 }
 0x222   :  { %v400_v40 = vmul.f32 %v857_v21, %v394_v0  ;;  %v455_v62 = vmul.f32 %v862_v58, %v449_v59  ;;  %v868_v21 = vld [vmem:[#allocation2 + $0x30] ss:$0 sm:$0xff] }
 0x224   :  { %v401_v43 = vadd.f32 %v400_v40, %v390_v39  ;;  %v869_v39 = vld [vmem:[#allocation2 + $0x31] ss:$0 sm:$0xff] }
 0x226   :  { %v405_v42 = vpop.permute.xlu1 %404  ;;  %v482_v10 = vpop.permute.xlu0 %481 }
 0x227   :  { %v411_v44 = vmul.f32 %v858_v41, %v405_v42  ;;  %v488_v13 = vmul.f32 %v865_v9, %v482_v10 }
 0x229   :  { %v412_v47 = vadd.f32 %v411_v44, %v401_v43  ;;  %v870_v44 = vld [vmem:[#allocation2 + $0x32] ss:$0 sm:$0xff] }
 0x22b   :  { %v427_v50 = vpop.permute.xlu1 %426  ;;  %v423_v51 = vadd.f32 %v422_v49, %v412_v47  ;;  %v515_v22 = vpop.permute.xlu0 %514 }
 0x22c   :  { %v433_v52 = vmul.f32 %v860_v48, %v427_v50  ;;  %v521_v40 = vmul.f32 %v868_v21, %v515_v22 }
 0x22e   :  { %v434_v56 = vadd.f32 %v433_v52, %v423_v51 }
 0x230   :  { %v438_v55 = vpop.permute.xlu1 %437  ;;  %v548_v46 = vpop.permute.xlu0 %547 }
 0x231   :  { %v444_v57 = vmul.f32 %v861_v53, %v438_v55  ;;  %v554_v50 = vmul.f32 %v871_v45, %v548_v46 }
 0x233   :  { %v445_v60 = vadd.f32 %v444_v57, %v434_v56 }
 0x235   :  { %v460_v63 = vpop.permute.xlu1 %459  ;;  %v456_v2 = vadd.f32 %v455_v62, %v445_v60 }
 0x236   :  { %v466_v5 = vmul.f32 %v863_v61, %v460_v63 }
 0x238   :  { %v467_v7 = vadd.f32 %v466_v5, %v456_v2 }
 0x23a   :  { %v471_v6 = vpop.permute.xlu1 %470 }
 0x23b   :  { %v477_v8 = vmul.f32 %v864_v1, %v471_v6 }
 0x23d   :  { %v478_v11 = vadd.f32 %v477_v8, %v467_v7 }
 0x23f   :  { %v493_v14 = vpop.permute.xlu1 %492  ;;  %v489_v15 = vadd.f32 %v488_v13, %v478_v11 }
 0x240   :  { %v499_v16 = vmul.f32 %v866_v12, %v493_v14  ;;  %v576_v14 = vld [vmem:[#allocation2 + $0x34] sm:$0x1] }
 0x242   :  { %v500_v19 = vadd.f32 %v499_v16, %v489_v15 }
 0x244   :  { %v504_v18 = vpop.permute.xlu1 %503 }
 0x245   :  { %v510_v20 = vmul.f32 %v867_v17, %v504_v18  ;;  %v580_v17 = vld [vmem:[#allocation2 + $0x35] sm:$0x1] }
 0x247   :  { %v511_v0 = vadd.f32 %v510_v20, %v500_v19 }
 0x249   :  { %v526_v41 = vpop.permute.xlu1 %525  ;;  %v522_v42 = vadd.f32 %v521_v40, %v511_v0 }
 0x24a   :  { %v532_v43 = vmul.f32 %v869_v39, %v526_v41 }
 0x24c   :  { %v533_v48 = vadd.f32 %v532_v43, %v522_v42  ;;  %v878_v42 = vld [vmem:[#allocation2 + $0x3e] ss:$0 sm:$0xff] }
 0x24e   :  { %v537_v47 = vpop.permute.xlu1 %536 }
 0x24f   :  { %v543_v49 = vmul.f32 %v870_v44, %v537_v47  ;;  %v879_v47 = vld [vmem:[#allocation2 + $0x3f] ss:$0 sm:$0xff] }
 0x251   :  { %v544_v51 = vadd.f32 %v543_v49, %v533_v48 }
 0x253   :  { %v555_v52 = vadd.f32 %v554_v50, %v544_v51  ;;  %v880_v51 = vld [vmem:[#allocation2 + $0x40] ss:$0 sm:$0xff] }
 0x255   :  { %v556_v53 = vsel %vm297_vm0, %v555_v52, 0.0  ;;  %v563_v55 = vmul.f32 %v555_v52, %v555_v52 }
 0x256   :  { %v557_v56 = vrot.slane %v556_v53, 4 }
 0x257   :  { %v564_v57 = vsel %vm297_vm0, %v563_v55, 0.0  ;;  %v881_v55 = vld [vmem:[#allocation2 + $0x41] ss:$0 sm:$0xff] }
 0x258   :  { %v558_v58 = vadd.f32 %v557_v56, %v556_v53  ;;  %v565_v59 = vrot.slane %v564_v57, 4 }
 0x25a   :  { %v559_v60 = vrot.slane %v558_v58, 2  ;;  %v566_v61 = vadd.f32 %v565_v59, %v564_v57 }
 0x25c   :  { %v560_v62 = vadd.f32 %v559_v60, %v558_v58  ;;  %v567_v63 = vrot.slane %v566_v61, 2  ;;  %v882_v60 = vld [vmem:[#allocation2 + $0x42] ss:$0 sm:$0xff] }
 0x25e   :  { %v561_v2 = vrot.slane %v560_v62, 1  ;;  %v568_v5 = vadd.f32 %v567_v63, %v566_v61 }
 0x260   :  { %v562_v1 = vadd.f32 %v561_v2, %v560_v62  ;;  %v569_v6 = vrot.slane %v568_v5, 1  ;;  %v883_v2 = vld [vmem:[#allocation2 + $0x43] ss:$0 sm:$0xff] }
 0x262   :  { %v570_v7 = vadd.f32 %v569_v6, %v568_v5  ;;  %v571_v8 = vmul.f32 0.125, %v562_v1  ;;  %v884_v6 = vld [vmem:[#allocation2 + $0x44] ss:$0 sm:$0xff] }
 0x264   :  { %v572_v9 = vmul.f32 0.125, %v570_v7  ;;  %v573_v10 = vmul.f32 %v571_v8, %v571_v8 }
 0x266   :  { %v574_v11 = vsub.f32 %v572_v9, %v573_v10 }
 0x268   :  { %v575_v12 = vmax.f32 %v574_v11, 0.0  ;;  %v885_v11 = vld [vmem:[#allocation2 + $0x45] ss:$0 sm:$0xff] }
 0x26a   :  { %v577_v13 = vadd.f32 1e-05, %v575_v12 }
 0x26c   :  { %982 = vrsqrt.f32 %v577_v13 }
 0x276   :  { %v983_v15 = vpop.eup %982 }
 0x277   :  { %v579_v16 = vmul.f32 %v983_v15, %v576_v14  ;;  %v886_v15 = vld [vmem:[#allocation2 + $0x46] ss:$0 sm:$0xff] }
 0x279   :  { %v581_v18 = vmul.f32 %v579_v16, %v571_v8  ;;  %v586_v19 = vrot.slane %v579_v16, %v1088_v54 }
 0x27b   :  { %v582_v20 = vsub.f32 %v580_v17, %v581_v18  ;;  %v587_v21 = vmul.f32 %v586_v19, %v555_v52  ;;  %v887_v18 = vld [vmem:[#allocation2 + $0x47] ss:$0 sm:$0xff] }
 0x27d   :  { %v591_v22 = vrot.slane %v582_v20, %v1088_v54 }
 0x27f   :  { %v592_v0 = vadd.f32 %v591_v22, %v587_v21 }
 0x281   :  { %v593_v39 = vmax.f32 %v592_v0, 0.0  ;;  %v888_v0 = vld [vmem:[#allocation2 + $0x48] ss:$0 sm:$0xff] }
 0x283   :  { %618 = vperm.xlu0 %961, %v593_v39   ;;  %597 = vperm.xlu1 %959, %v593_v39  }
 0x287   :  { %964 = vset.pattern.permute.xlu0 %v1018_v26  ;;  %960 = vset.pattern.permute.xlu1 %v1013_v3 }
 0x288   :  { %651 = vperm.xlu0 %964, %v593_v39   ;;  %607 = vperm.xlu1 %960, %v593_v39  }
 0x28c   :  { %967 = vset.pattern.permute.xlu0 %v1022_v30  ;;  %962 = vset.pattern.permute.xlu1 %v1014_v4  ;;  %v872_v4 = vld [vmem:[#allocation2 + $0x38] ss:$0 sm:$0xff] }
 0x28d   :  { %684 = vperm.xlu0 %967, %v593_v39   ;;  %629 = vperm.xlu1 %962, %v593_v39  }
 0x291   :  { %970 = vset.pattern.permute.xlu0 %v1025_v33  ;;  %963 = vset.pattern.permute.xlu1 %v1016_v24 }
 0x292   :  { %717 = vperm.xlu0 %970, %v593_v39   ;;  %640 = vperm.xlu1 %963, %v593_v39  }
 0x296   :  { %973 = vset.pattern.permute.xlu0 %v1027_v35  ;;  %965 = vset.pattern.permute.xlu1 %v1015_v23  ;;  %v873_v23 = vld [vmem:[#allocation2 + $0x39] ss:$0 sm:$0xff] }
 0x297   :  { %750 = vperm.xlu0 %973, %v593_v39   ;;  %662 = vperm.xlu1 %965, %v593_v39  }
 0x29b   :  { %976 = vset.pattern.permute.xlu0 %v1029_v37  ;;  %966 = vset.pattern.permute.xlu1 %v1020_v28 }
 0x29c   :  { %783 = vperm.xlu0 %976, %v593_v39   ;;  %673 = vperm.xlu1 %966, %v593_v39  }
 0x2a0   :  { %968 = vset.pattern.permute.xlu1 %v1017_v25  ;;  %979 = vset.pattern.permute.xlu0 %v1030_v38 }
 0x2a1   :  { %695 = vperm.xlu1 %968, %v593_v39  }
 0x2a5   :  { %969 = vset.pattern.permute.xlu1 %v1024_v32 }
 0x2a6   :  { %706 = vperm.xlu1 %969, %v593_v39  }
 0x2aa   :  { %971 = vset.pattern.permute.xlu1 %v1019_v27  ;;  %v874_v27 = vld [vmem:[#allocation2 + $0x3a] ss:$0 sm:$0xff] }
 0x2ab   :  { %728 = vperm.xlu1 %971, %v593_v39  }
 0x2af   :  { %972 = vset.pattern.permute.xlu1 %v1026_v34 }
 0x2b0   :  { %739 = vperm.xlu1 %972, %v593_v39  }
 0x2b4   :  { %974 = vset.pattern.permute.xlu1 %v1021_v29  ;;  %v875_v29 = vld [vmem:[#allocation2 + $0x3b] ss:$0 sm:$0xff] }
 0x2b5   :  { %761 = vperm.xlu1 %974, %v593_v39  }
 0x2b9   :  { %975 = vset.pattern.permute.xlu1 %v1028_v36  ;;  %v876_v36 = vld [vmem:[#allocation2 + $0x3c] ss:$0 sm:$0xff] }
 0x2ba   :  { %772 = vperm.xlu1 %975, %v593_v39  }
 0x2be   :  { %977 = vset.pattern.permute.xlu1 %v1023_v31 }
 0x2bf   :  { %794 = vperm.xlu1 %977, %v593_v39  }
 0x2c3   :  { %978 = vset.pattern.permute.xlu1 %v1030_v38  ;;  %v877_v38 = vld [vmem:[#allocation2 + $0x3d] ss:$0 sm:$0xff] }
 0x2c4   :  { %805 = vperm.xlu1 %978, %v593_v39  }
 0x302   :  { %v598_v3 = vpop.permute.xlu1 %597  ;;  %v619_v28 = vpop.permute.xlu0 %618 }
 0x303   :  { %v604_v25 = vmul.f32 %v872_v4, %v598_v3  ;;  %v625_v32 = vmul.f32 %v874_v27, %v619_v28 }
 0x307   :  { %v608_v24 = vpop.permute.xlu1 %607  ;;  %v652_v40 = vpop.permute.xlu0 %651 }
 0x308   :  { %v614_v26 = vmul.f32 %v873_v23, %v608_v24  ;;  %v658_v43 = vmul.f32 %v877_v38, %v652_v40  ;;  %v889_v23 = vld [vmem:[#allocation2 + $0x49] ss:$0 sm:$0xff] }
 0x30a   :  { %v615_v30 = vadd.f32 %v614_v26, %v604_v25  ;;  %v890_v26 = vld [vmem:[#allocation2 + $0x4a] ss:$0 sm:$0xff] }
 0x30c   :  { %v630_v33 = vpop.permute.xlu1 %629  ;;  %v626_v34 = vadd.f32 %v625_v32, %v615_v30  ;;  %v685_v52 = vpop.permute.xlu0 %684  ;;  %v891_v32 = vld [vmem:[#allocation2 + $0x4b] ss:$0 sm:$0xff] }
 0x30d   :  { %v636_v35 = vmul.f32 %v875_v29, %v630_v33  ;;  %v691_v56 = vmul.f32 %v880_v51, %v685_v52 }
 0x30f   :  { %v637_v37 = vadd.f32 %v636_v35, %v626_v34 }
 0x311   :  { %v641_v31 = vpop.permute.xlu1 %640  ;;  %v718_v5 = vpop.permute.xlu0 %717 }
 0x312   :  { %v647_v54 = vmul.f32 %v876_v36, %v641_v31  ;;  %v724_v7 = vmul.f32 %v883_v2, %v718_v5  ;;  %v892_v36 = vld [vmem:[#allocation2 + $0x4c] ss:$0 sm:$0xff] }
 0x314   :  { %v648_v41 = vadd.f32 %v647_v54, %v637_v37 }
 0x316   :  { %v663_v44 = vpop.permute.xlu1 %662  ;;  %v659_v45 = vadd.f32 %v658_v43, %v648_v41  ;;  %v751_v16 = vpop.permute.xlu0 %750 }
 0x317   :  { %v669_v46 = vmul.f32 %v878_v42, %v663_v44  ;;  %v757_v19 = vmul.f32 %v886_v15, %v751_v16 }
 0x319   :  { %v670_v49 = vadd.f32 %v669_v46, %v659_v45 }
 0x31b   :  { %v674_v48 = vpop.permute.xlu1 %673  ;;  %v784_v24 = vpop.permute.xlu0 %783 }
 0x31c   :  { %v680_v50 = vmul.f32 %v879_v47, %v674_v48  ;;  %v790_v27 = vmul.f32 %v889_v23, %v784_v24 }
 0x31e   :  { %v681_v53 = vadd.f32 %v680_v50, %v670_v49 }
 0x320   :  { %v696_v57 = vpop.permute.xlu1 %695  ;;  %v692_v58 = vadd.f32 %v691_v56, %v681_v53 }
 0x321   :  { %v702_v59 = vmul.f32 %v881_v55, %v696_v57 }
 0x323   :  { %v703_v62 = vadd.f32 %v702_v59, %v692_v58 }
 0x325   :  { %v707_v61 = vpop.permute.xlu1 %706 }
 0x326   :  { %v713_v63 = vmul.f32 %v882_v60, %v707_v61 }
 0x328   :  { %v714_v1 = vadd.f32 %v713_v63, %v703_v62 }
 0x32a   :  { %v729_v8 = vpop.permute.xlu1 %728  ;;  %v725_v9 = vadd.f32 %v724_v7, %v714_v1 }
 0x32b   :  { %v735_v10 = vmul.f32 %v884_v6, %v729_v8 }
 0x32d   :  { %v736_v13 = vadd.f32 %v735_v10, %v725_v9 }
 0x32f   :  { %v740_v12 = vpop.permute.xlu1 %739 }
 0x330   :  { %v746_v14 = vmul.f32 %v885_v11, %v740_v12 }
 0x332   :  { %v747_v17 = vadd.f32 %v746_v14, %v736_v13 }
 0x334   :  { %v762_v20 = vpop.permute.xlu1 %761  ;;  %v758_v21 = vadd.f32 %v757_v19, %v747_v17 }
 0x335   :  { %v768_v22 = vmul.f32 %v887_v18, %v762_v20 }
 0x337   :  { %v769_v3 = vadd.f32 %v768_v22, %v758_v21 }
 0x339   :  { %v773_v39 = vpop.permute.xlu1 %772 }
 0x33a   :  { %v779_v4 = vmul.f32 %v888_v0, %v773_v39 }
 0x33c   :  { %v780_v25 = vadd.f32 %v779_v4, %v769_v3 }
 0x33e   :  { %v795_v28 = vpop.permute.xlu1 %794  ;;  %v791_v30 = vadd.f32 %v790_v27, %v780_v25 }
 0x33f   :  { %v801_v29 = vmul.f32 %v890_v26, %v795_v28 }
 0x341   :  { %v802_v34 = vadd.f32 %v801_v29, %v791_v30 }
 0x343   :  { %v806_v33 = vpop.permute.xlu1 %805 }
 0x344   :  { %v812_v35 = vmul.f32 %v891_v32, %v806_v33 }
 0x346   :  { %v813_v31 = vadd.f32 %v812_v35, %v802_v34 }
 0x348   :  { %v819_v37 = vadd.f32 %v892_v36, %v813_v31 }
 0x34a   :  { %821 = vst.msk [vmem:[%s1140_s2] sm:$0xff] %vm820_vm1, %v819_v37 }
 0x34b   :  { %826 = vsyncpa [#allocation3], 1 }

</bundles_post_ra>
